<compile_context>
chip_gen: v6e
topology: v6e:2x2x1
jax: 0.10.0
libtpu: 0.0.40
codegen_flags: <defaults>
</compile_context>

<pallas_src>
import functools

import jax
import jax.numpy as jnp
from jax.experimental import pallas as pl
from jax.experimental.pallas import tpu as pltpu


def _round_up(x, m):
    return ((x + m - 1) // m) * m


def _pick_row_tile(ho, wo, target_rows=512):
    """Largest divisor d of `ho` with d*wo <= target_rows and (d*wo) % 8 == 0.

    Falls back to the full height (single row tile); a full-extent block is
    always a legal BlockSpec shape.
    """
    best = None
    for d in range(1, ho + 1):
        if ho % d == 0 and d * wo <= target_rows and (d * wo) % 8 == 0:
            best = d
    return best if best is not None else ho


def _conv_taps_kernel(x_ref, w_ref, b_ref, o_ref, *,
                      KH, KW, stride, TH, TH_in, Wo, Cin):
    """One grid step computes TH output rows of one image.

    x_ref : (1, Hp, Wp, Cin)      bf16  whole reflection-padded image (NHWC)
    w_ref : (KH*KW, Cin, Cout_p)  bf16  per-tap weights, Cout zero-padded to 128
    b_ref : (1, Cout_p)           f32
    o_ref : (1, TH*Wo, Cout_p)    f32   lane-dense output tile
    """
    r = pl.program_id(1)
    row0 = pl.multiple_of(r * (TH * stride), TH * stride)
    # Contiguous input row band covering this tile's receptive field (halo included).
    xb = x_ref[0, pl.ds(row0, TH_in), :, :]               # (TH_in, Wp, Cin) bf16

    h_hi = (TH - 1) * stride + 1
    w_hi = (Wo - 1) * stride + 1
    cout_p = o_ref.shape[-1]

    # Init accumulator with the (broadcast) bias -> bias add is free.
    acc = jnp.broadcast_to(b_ref[...], (TH * Wo, cout_p)).astype(jnp.float32)
    # Fused im2col: the KH*KW shifted views are free static slices of the VMEM band;
    # each tap is a bf16 MXU matmul accumulated in f32.
    for kh in range(KH):
        for kw in range(KW):
            piece = xb[kh:kh + h_hi:stride, kw:kw + w_hi:stride, :]   # (TH, Wo, Cin)
            a = piece.reshape(TH * Wo, Cin)                           # safe merge (minor dim kept)
            acc = acc + jnp.dot(a, w_ref[kh * KW + kw],
                                preferred_element_type=jnp.float32)
    o_ref[0, :, :] = acc                                  # lane-dense f32 store


def _conv2d_pallas(xh, w_taps, bias_p, *, KH, KW, stride, Ho, Wo, target_rows=512):
    """xh: (N, Hp, Wp, Cin) bf16 padded NHWC; returns (N, Ho*Wo, Cout_p) f32."""
    N, Hp, Wp, Cin = xh.shape
    n_taps, cin2, cout_p = w_taps.shape
    assert n_taps == KH * KW and cin2 == Cin

    TH = _pick_row_tile(Ho, Wo, target_rows)
    R = Ho // TH
    TH_in = (TH - 1) * stride + KH

    kernel = functools.partial(
        _conv_taps_kernel, KH=KH, KW=KW, stride=stride,
        TH=TH, TH_in=TH_in, Wo=Wo, Cin=Cin)

    return pl.pallas_call(
        kernel,
        out_shape=jax.ShapeDtypeStruct((N, Ho * Wo, cout_p), jnp.float32),
        grid_spec=pltpu.PrefetchScalarGridSpec(
            num_scalar_prefetch=0,
            grid=(N, R),
            in_specs=[
                # Whole padded image per batch element; block index is constant across
                # the (inner) row-tile axis so it is not re-fetched per row tile.
                pl.BlockSpec((1, Hp, Wp, Cin), lambda n, r: (n, 0, 0, 0)),
                # Weights / bias: constant block index -> DMA'd once for the whole grid.
                pl.BlockSpec((n_taps, Cin, cout_p), lambda n, r: (0, 0, 0)),
                pl.BlockSpec((1, cout_p), lambda n, r: (0, 0)),
            ],
            out_specs=pl.BlockSpec((1, TH * Wo, cout_p), lambda n, r: (n, r, 0)),
        ),
        compiler_params=pltpu.CompilerParams(
            dimension_semantics=("parallel", "parallel"),
            vmem_limit_bytes=32 * 1024 * 1024,   # explicit budget; safe on v5e/v6e/v7x
        ),
    )(xh, w_taps, bias_p)


class ConvLayer:
    """JAX/Pallas port of the PyTorch ConvLayer (ReflectionPad2d + Conv2d). NCHW in/out."""

    def __init__(self, in_channels, out_channels, kernel_size, stride, *, key):
        self.in_channels = in_channels
        self.out_channels = out_channels
        self.kernel_size = kernel_size
        self.stride = stride
        self.padding = kernel_size // 2

        k_w, k_b = jax.random.split(key)
        fan_in = in_channels * kernel_size * kernel_size
        bound = 1.0 / (fan_in ** 0.5)
        # Deterministic init mimicking PyTorch Conv2d default uniform bounds.
        self.weight = jax.random.uniform(
            k_w, (out_channels, in_channels, kernel_size, kernel_size),
            minval=-bound, maxval=bound, dtype=jnp.float32)            # OIHW
        self.bias = jax.random.uniform(
            k_b, (out_channels,), minval=-bound, maxval=bound, dtype=jnp.float32)

        # One-time weight prep: per-tap (KH*KW, Cin, Cout_p) with Cout zero-padded
        # to a multiple of 128 (lane-dense MXU output / stores), cast to bf16.
        self.cout_p = _round_up(out_channels, 128)
        w_taps = jnp.transpose(self.weight, (2, 3, 1, 0)).reshape(
            kernel_size * kernel_size, in_channels, out_channels)      # (KH*KW, Cin, Cout)
        self.w_taps = jnp.pad(
            w_taps, ((0, 0), (0, 0), (0, self.cout_p - out_channels))).astype(jnp.bfloat16)
        self.bias_p = jnp.pad(
            self.bias, (0, self.cout_p - out_channels)).reshape(1, self.cout_p)  # f32

    def __call__(self, x):
        # x: (N, Cin, H, W) f32 NCHW (PyTorch layout).
        N, Cin, H, W = x.shape
        KH = KW = self.kernel_size
        st = self.stride
        p = self.padding

        xp = x
        if p > 0:
            xp = jnp.pad(xp, ((0, 0), (0, 0), (p, p), (p, p)), mode="reflect")
        # NCHW -> NHWC (channels on the lane dim) + bf16 cast, once (fuses under jit).
        # TODO(synk): keep the surrounding model NHWC end-to-end (and fold the
        # reflection pad into the kernel's index math) to remove these glue copies.
        xh = jnp.transpose(xp, (0, 2, 3, 1)).astype(jnp.bfloat16)
        Hp, Wp = H + 2 * p, W + 2 * p
        Ho = (Hp - KH) // st + 1
        Wo = (Wp - KW) // st + 1

        out = _conv2d_pallas(xh, self.w_taps, self.bias_p,
                             KH=KH, KW=KW, stride=st, Ho=Ho, Wo=Wo)
        # (N, Ho*Wo, Cout_p) f32 -> (N, Cout, Ho, Wo); slice + reshape + transpose
        # fuse into one small XLA copy under jit.
        out = out[:, :, :self.out_channels].reshape(N, Ho, Wo, self.out_channels)
        return jnp.transpose(out, (0, 3, 1, 2))


def _reference_forward(layer, x, bf16_operands):
    """Pure-JAX reference (reflection pad + VALID conv + bias)."""
    p = layer.padding
    xp = x
    if p > 0:
        xp = jnp.pad(xp, ((0, 0), (0, 0), (p, p), (p, p)), mode="reflect")
    w = layer.weight
    if bf16_operands:
        xp = xp.astype(jnp.bfloat16)
        w = w.astype(jnp.bfloat16)
    out = jax.lax.conv_general_dilated(
        xp, w, (layer.stride, layer.stride), "VALID",
        dimension_numbers=("NCHW", "OIHW", "NCHW"),
        preferred_element_type=jnp.float32)
    return out + layer.bias.reshape(1, -1, 1, 1)


if __name__ == "__main__":
    key = jax.random.PRNGKey(0)
    k_x, k_layer = jax.random.split(key)

    # Small shapes consistent with the module: batch=2, in_ch=4, out_ch=8, 16x16 spatial.
    x = jax.random.normal(k_x, (2, 4, 16, 16), dtype=jnp.float32)
    layer = ConvLayer(in_channels=4, out_channels=8, kernel_size=3, stride=1, key=k_layer)

    fwd = jax.jit(layer.__call__)
    y = jax.block_until_ready(fwd(x))
    assert y.shape == (2, 8, 16, 16), y.shape

    # Tight check: reference using the same bf16 operands with f32 accumulation.
    y_bf = jax.block_until_ready(_reference_forward(layer, x, bf16_operands=True))
    assert jnp.allclose(y, y_bf, atol=1e-2, rtol=1e-2), "mismatch vs bf16-operand reference"

    # Loose sanity check vs full-f32 reference (difference = bf16 operand rounding only).
    y_f32 = jax.block_until_ready(_reference_forward(layer, x, bf16_operands=False))
    assert jnp.allclose(y, y_f32, atol=1e-1, rtol=1e-1), "mismatch vs f32 reference"

    print("KERNEL_OK")
</pallas_src>

<mosaic_0001>
module attributes {stable_mosaic.version = 11 : i64} {
  func.func @_conv_taps_kernel(%arg0: i32, %arg1: i32, %arg2: memref<1x18x18x4xbf16, #tpu.memory_space<vmem>>, %arg3: memref<9x4x128xbf16, #tpu.memory_space<vmem>>, %arg4: memref<1x128xf32, #tpu.memory_space<vmem>>, %arg5: memref<1x256x128xf32, #tpu.memory_space<vmem>>) attributes {dimension_semantics = [#tpu.dimension_semantics<parallel>, #tpu.dimension_semantics<parallel>], iteration_bounds = array<i64: 2, 1>, scalar_prefetch = 0 : i64, scratch_operands = 0 : i64, tpu.core_type = #tpu.core_type<tc>, window_params = [{transform_indices = @transform_0, window_bounds = array<i64: 1, 18, 18, 4>}, {pipeline_mode = #tpu.pipeline_mode<synchronous>, transform_indices = @transform_1, window_bounds = array<i64: 9, 4, 128>}, {pipeline_mode = #tpu.pipeline_mode<synchronous>, transform_indices = @transform_2, window_bounds = array<i64: 1, 128>}, {transform_indices = @transform_3, window_bounds = array<i64: 1, 256, 128>}]} {
    %c16_i32 = arith.constant 16 : i32
    %0 = arith.muli %arg1, %c16_i32 : i32
    %1 = tpu.assume_multiple %0, 16 : i32
    %c0 = arith.constant 0 : index
    %2 = arith.index_cast %1 : i32 to index
    %c0_0 = arith.constant 0 : index
    %c0_1 = arith.constant 0 : index
    %3 = vector.load %arg2[%c0, %2, %c0_0, %c0_1] : memref<1x18x18x4xbf16, #tpu.memory_space<vmem>>, vector<1x18x18x4xbf16>
    %4 = vector.shape_cast %3 : vector<1x18x18x4xbf16> to vector<18x18x4xbf16>
    %c0_2 = arith.constant 0 : index
    %c0_3 = arith.constant 0 : index
    %5 = vector.load %arg4[%c0_2, %c0_3] : memref<1x128xf32, #tpu.memory_space<vmem>>, vector<1x128xf32>
    %6 = vector.shape_cast %5 : vector<1x128xf32> to vector<1x128xf32>
    %7 = vector.broadcast %6 : vector<1x128xf32> to vector<256x128xf32>
    %8 = vector.extract_strided_slice %4 {offsets = [0, 0, 0], sizes = [16, 16, 4], strides = [1, 1, 1]} : vector<18x18x4xbf16> to vector<16x16x4xbf16>
    %9 = vector.shape_cast %8 : vector<16x16x4xbf16> to vector<256x4xbf16>
    %c0_4 = arith.constant 0 : index
    %c0_5 = arith.constant 0 : index
    %c0_6 = arith.constant 0 : index
    %10 = vector.load %arg3[%c0_4, %c0_5, %c0_6] : memref<9x4x128xbf16, #tpu.memory_space<vmem>>, vector<1x4x128xbf16>
    %11 = vector.shape_cast %10 : vector<1x4x128xbf16> to vector<4x128xbf16>
    %cst = arith.constant dense<0.000000e+00> : vector<256x128xf32>
    %12 = tpu.matmul %9, %11, %cst {dimension_numbers = #tpu.dot_dimension_numbers<[1], [0], [0], [1], [0, 0, 1, 1], [], []>} : vector<256x4xbf16>, vector<4x128xbf16>, vector<256x128xf32> -> vector<256x128xf32>
    %13 = arith.addf %7, %12 : vector<256x128xf32>
    %14 = vector.extract_strided_slice %4 {offsets = [0, 1, 0], sizes = [16, 16, 4], strides = [1, 1, 1]} : vector<18x18x4xbf16> to vector<16x16x4xbf16>
    %15 = vector.shape_cast %14 : vector<16x16x4xbf16> to vector<256x4xbf16>
    %c1 = arith.constant 1 : index
    %c0_7 = arith.constant 0 : index
    %c0_8 = arith.constant 0 : index
    %16 = vector.load %arg3[%c1, %c0_7, %c0_8] : memref<9x4x128xbf16, #tpu.memory_space<vmem>>, vector<1x4x128xbf16>
    %17 = vector.shape_cast %16 : vector<1x4x128xbf16> to vector<4x128xbf16>
    %cst_9 = arith.constant dense<0.000000e+00> : vector<256x128xf32>
    %18 = tpu.matmul %15, %17, %cst_9 {dimension_numbers = #tpu.dot_dimension_numbers<[1], [0], [0], [1], [0, 0, 1, 1], [], []>} : vector<256x4xbf16>, vector<4x128xbf16>, vector<256x128xf32> -> vector<256x128xf32>
    %19 = arith.addf %13, %18 : vector<256x128xf32>
    %20 = vector.extract_strided_slice %4 {offsets = [0, 2, 0], sizes = [16, 16, 4], strides = [1, 1, 1]} : vector<18x18x4xbf16> to vector<16x16x4xbf16>
    %21 = vector.shape_cast %20 : vector<16x16x4xbf16> to vector<256x4xbf16>
    %c2 = arith.constant 2 : index
    %c0_10 = arith.constant 0 : index
    %c0_11 = arith.constant 0 : index
    %22 = vector.load %arg3[%c2, %c0_10, %c0_11] : memref<9x4x128xbf16, #tpu.memory_space<vmem>>, vector<1x4x128xbf16>
    %23 = vector.shape_cast %22 : vector<1x4x128xbf16> to vector<4x128xbf16>
    %cst_12 = arith.constant dense<0.000000e+00> : vector<256x128xf32>
    %24 = tpu.matmul %21, %23, %cst_12 {dimension_numbers = #tpu.dot_dimension_numbers<[1], [0], [0], [1], [0, 0, 1, 1], [], []>} : vector<256x4xbf16>, vector<4x128xbf16>, vector<256x128xf32> -> vector<256x128xf32>
    %25 = arith.addf %19, %24 : vector<256x128xf32>
    %26 = vector.extract_strided_slice %4 {offsets = [1, 0, 0], sizes = [16, 16, 4], strides = [1, 1, 1]} : vector<18x18x4xbf16> to vector<16x16x4xbf16>
    %27 = vector.shape_cast %26 : vector<16x16x4xbf16> to vector<256x4xbf16>
    %c3 = arith.constant 3 : index
    %c0_13 = arith.constant 0 : index
    %c0_14 = arith.constant 0 : index
    %28 = vector.load %arg3[%c3, %c0_13, %c0_14] : memref<9x4x128xbf16, #tpu.memory_space<vmem>>, vector<1x4x128xbf16>
    %29 = vector.shape_cast %28 : vector<1x4x128xbf16> to vector<4x128xbf16>
    %cst_15 = arith.constant dense<0.000000e+00> : vector<256x128xf32>
    %30 = tpu.matmul %27, %29, %cst_15 {dimension_numbers = #tpu.dot_dimension_numbers<[1], [0], [0], [1], [0, 0, 1, 1], [], []>} : vector<256x4xbf16>, vector<4x128xbf16>, vector<256x128xf32> -> vector<256x128xf32>
    %31 = arith.addf %25, %30 : vector<256x128xf32>
    %32 = vector.extract_strided_slice %4 {offsets = [1, 1, 0], sizes = [16, 16, 4], strides = [1, 1, 1]} : vector<18x18x4xbf16> to vector<16x16x4xbf16>
    %33 = vector.shape_cast %32 : vector<16x16x4xbf16> to vector<256x4xbf16>
    %c4 = arith.constant 4 : index
    %c0_16 = arith.constant 0 : index
    %c0_17 = arith.constant 0 : index
    %34 = vector.load %arg3[%c4, %c0_16, %c0_17] : memref<9x4x128xbf16, #tpu.memory_space<vmem>>, vector<1x4x128xbf16>
    %35 = vector.shape_cast %34 : vector<1x4x128xbf16> to vector<4x128xbf16>
    %cst_18 = arith.constant dense<0.000000e+00> : vector<256x128xf32>
    %36 = tpu.matmul %33, %35, %cst_18 {dimension_numbers = #tpu.dot_dimension_numbers<[1], [0], [0], [1], [0, 0, 1, 1], [], []>} : vector<256x4xbf16>, vector<4x128xbf16>, vector<256x128xf32> -> vector<256x128xf32>
    %37 = arith.addf %31, %36 : vector<256x128xf32>
    %38 = vector.extract_strided_slice %4 {offsets = [1, 2, 0], sizes = [16, 16, 4], strides = [1, 1, 1]} : vector<18x18x4xbf16> to vector<16x16x4xbf16>
    %39 = vector.shape_cast %38 : vector<16x16x4xbf16> to vector<256x4xbf16>
    %c5 = arith.constant 5 : index
    %c0_19 = arith.constant 0 : index
    %c0_20 = arith.constant 0 : index
    %40 = vector.load %arg3[%c5, %c0_19, %c0_20] : memref<9x4x128xbf16, #tpu.memory_space<vmem>>, vector<1x4x128xbf16>
    %41 = vector.shape_cast %40 : vector<1x4x128xbf16> to vector<4x128xbf16>
    %cst_21 = arith.constant dense<0.000000e+00> : vector<256x128xf32>
    %42 = tpu.matmul %39, %41, %cst_21 {dimension_numbers = #tpu.dot_dimension_numbers<[1], [0], [0], [1], [0, 0, 1, 1], [], []>} : vector<256x4xbf16>, vector<4x128xbf16>, vector<256x128xf32> -> vector<256x128xf32>
    %43 = arith.addf %37, %42 : vector<256x128xf32>
    %44 = vector.extract_strided_slice %4 {offsets = [2, 0, 0], sizes = [16, 16, 4], strides = [1, 1, 1]} : vector<18x18x4xbf16> to vector<16x16x4xbf16>
    %45 = vector.shape_cast %44 : vector<16x16x4xbf16> to vector<256x4xbf16>
    %c6 = arith.constant 6 : index
    %c0_22 = arith.constant 0 : index
    %c0_23 = arith.constant 0 : index
    %46 = vector.load %arg3[%c6, %c0_22, %c0_23] : memref<9x4x128xbf16, #tpu.memory_space<vmem>>, vector<1x4x128xbf16>
    %47 = vector.shape_cast %46 : vector<1x4x128xbf16> to vector<4x128xbf16>
    %cst_24 = arith.constant dense<0.000000e+00> : vector<256x128xf32>
    %48 = tpu.matmul %45, %47, %cst_24 {dimension_numbers = #tpu.dot_dimension_numbers<[1], [0], [0], [1], [0, 0, 1, 1], [], []>} : vector<256x4xbf16>, vector<4x128xbf16>, vector<256x128xf32> -> vector<256x128xf32>
    %49 = arith.addf %43, %48 : vector<256x128xf32>
    %50 = vector.extract_strided_slice %4 {offsets = [2, 1, 0], sizes = [16, 16, 4], strides = [1, 1, 1]} : vector<18x18x4xbf16> to vector<16x16x4xbf16>
    %51 = vector.shape_cast %50 : vector<16x16x4xbf16> to vector<256x4xbf16>
    %c7 = arith.constant 7 : index
    %c0_25 = arith.constant 0 : index
    %c0_26 = arith.constant 0 : index
    %52 = vector.load %arg3[%c7, %c0_25, %c0_26] : memref<9x4x128xbf16, #tpu.memory_space<vmem>>, vector<1x4x128xbf16>
    %53 = vector.shape_cast %52 : vector<1x4x128xbf16> to vector<4x128xbf16>
    %cst_27 = arith.constant dense<0.000000e+00> : vector<256x128xf32>
    %54 = tpu.matmul %51, %53, %cst_27 {dimension_numbers = #tpu.dot_dimension_numbers<[1], [0], [0], [1], [0, 0, 1, 1], [], []>} : vector<256x4xbf16>, vector<4x128xbf16>, vector<256x128xf32> -> vector<256x128xf32>
    %55 = arith.addf %49, %54 : vector<256x128xf32>
    %56 = vector.extract_strided_slice %4 {offsets = [2, 2, 0], sizes = [16, 16, 4], strides = [1, 1, 1]} : vector<18x18x4xbf16> to vector<16x16x4xbf16>
    %57 = vector.shape_cast %56 : vector<16x16x4xbf16> to vector<256x4xbf16>
    %c8 = arith.constant 8 : index
    %c0_28 = arith.constant 0 : index
    %c0_29 = arith.constant 0 : index
    %58 = vector.load %arg3[%c8, %c0_28, %c0_29] : memref<9x4x128xbf16, #tpu.memory_space<vmem>>, vector<1x4x128xbf16>
    %59 = vector.shape_cast %58 : vector<1x4x128xbf16> to vector<4x128xbf16>
    %cst_30 = arith.constant dense<0.000000e+00> : vector<256x128xf32>
    %60 = tpu.matmul %57, %59, %cst_30 {dimension_numbers = #tpu.dot_dimension_numbers<[1], [0], [0], [1], [0, 0, 1, 1], [], []>} : vector<256x4xbf16>, vector<4x128xbf16>, vector<256x128xf32> -> vector<256x128xf32>
    %61 = arith.addf %55, %60 : vector<256x128xf32>
    %c0_31 = arith.constant 0 : index
    %c0_32 = arith.constant 0 : index
    %c0_33 = arith.constant 0 : index
    %62 = vector.load %arg5[%c0_31, %c0_32, %c0_33] : memref<1x256x128xf32, #tpu.memory_space<vmem>>, vector<1x256x128xf32>
    %63 = vector.shape_cast %62 : vector<1x256x128xf32> to vector<256x128xf32>
    %64 = vector.shape_cast %61 : vector<256x128xf32> to vector<1x256x128xf32>
    tpu.vector_store %arg5[%c0_31, %c0_32, %c0_33], %64 {strides = array<i32>} : memref<1x256x128xf32, #tpu.memory_space<vmem>>, vector<1x256x128xf32>,
    return
  }
  func.func @transform_0(%arg0: i32, %arg1: i32) -> (i32, i32, i32, i32) {
    %c0_i32 = arith.constant 0 : i32
    %c0_i32_0 = arith.constant 0 : i32
    %c0_i32_1 = arith.constant 0 : i32
    %c0_i32_2 = arith.constant 0 : i32
    return %arg0, %c0_i32, %c0_i32_0, %c0_i32_1 : i32, i32, i32, i32
  }
  func.func @transform_1(%arg0: i32, %arg1: i32) -> (i32, i32, i32) {
    %c0_i32 = arith.constant 0 : i32
    %c0_i32_0 = arith.constant 0 : i32
    %c0_i32_1 = arith.constant 0 : i32
    %c0_i32_2 = arith.constant 0 : i32
    return %c0_i32, %c0_i32_0, %c0_i32_1 : i32, i32, i32
  }
  func.func @transform_2(%arg0: i32, %arg1: i32) -> (i32, i32) {
    %c0_i32 = arith.constant 0 : i32
    %c0_i32_0 = arith.constant 0 : i32
    %c0_i32_1 = arith.constant 0 : i32
    return %c0_i32, %c0_i32_0 : i32, i32
  }
  func.func @transform_3(%arg0: i32, %arg1: i32) -> (i32, i32, i32) {
    %c0_i32 = arith.constant 0 : i32
    %c0_i32_0 = arith.constant 0 : i32
    return %arg0, %arg1, %c0_i32 : i32, i32, i32
  }
}

</mosaic_0001>

<bundles_post_ra>
// kernel: a_call__.1
= control target key start
LH: loop header
LB: loop body
LE: loop exit
PB: predicated region body
PF: predicated region fallthrough
CT: control target
= control target key end

     0   :  { %s3894_s12 = smov 0   ;;  %s3896_s13 = smov 0   ;;  %s5475_s0 = inlined_call_operand.vmem [shape: bf16[2,18,18,4], index: 0, kind: input, shape index: {}]   ;;  %s5476_s1 = inlined_call_operand.vmem [shape: bf16[9,4,128], index: 1, kind: input, shape index: {}]   ;;  %s5477_s2 = inlined_call_operand.vmem [shape: f32[1,128], index: 2, kind: input, shape index: {}]   ;;  %s5478_s3 = inlined_call_operand.vmem [shape: f32[2,256,128], index: 3, kind: output, shape index: {}]  }
   0x1   :  { %s3898_s14 = smov 0  }
   0x2 LB: > { %s25_s15 = sadd.s32 1, %s3868_s13  ;;  %p3104_p0 = scmp.ge.s32.totalorder %s3872_s14, 1  ;;  %s3872_s14 = sphi %s3898_s14, %s13_s14   ;;  %s3868_s13 = sphi %s3896_s13, %s5705_s13   ;;  %s3864_s12 = sphi %s3894_s12, %s5704_s12  }
   0x3   : > { %p27_p1 = scmp.ge.s32.totalorder %s25_s15, 2  ;;  %p151_p2 = scmp.lt.s32.totalorder %s3872_s14, 3 }
   0x5   : > { %s5707_s15 = smov (%p27_p1, %s25_s15), 0  ;;  %p152_p3 = pnand %p3104_p0, %p151_p2 }
   0x7   : > { %155 = sbr.rel (%p152_p3) target bundleno = 525 (0x20d), region = 32 }
   0xc   : > { %v260_v0 = vld [vmem:[%s5476_s1] sm:$0x3]  ;;  %vm390_vm0 = vcmask 1041408   ;;  %p179_p4 = scmp.lt.s32.totalorder %s3864_s12, 1  ;;  %v3141_v2 = vld [vmem:[%s5476_s1 + $0x2] sm:$0x3] }
   0xd   : > { %3798 = vmatprep.subr.msk.bf16.mxu1 %vm390_vm0, %v260_v0  ;;  %3797 = vmatprep.subr.msk.bf16.mxu0 %vm390_vm0, %v260_v0  ;;  %v392_v1 = vsel %vm390_vm0, %v260_v0, 0  ;;  %v3190_v3 = vld [vmem:[%s5476_s1 + $0x4] sm:$0x3]  ;;  %v3931_v4 = vld [vmem:[%s5476_s1 + $0x6] sm:$0x3]  ;;  %vm341_vm1 = vcmask 31744  }
   0xe   : > { %3796 = vmatpush3.bf16.msra.mxu1 %v392_v1  ;;  %3490 = vmatpush3.bf16.msra.mxu0 %v392_v1  ;;  %s5709_s12 = smov (!%p179_p4, %s3864_s12), 1  ;;  %v3936_v5 = vld [vmem:[%s5476_s1 + $0x8] sm:$0x3]  ;;  %v3945_v6 = vsel %vm390_vm0, %v3141_v2, 0  ;;  %v1498_v7 = vsel %vm390_vm0, %v3190_v3, 0  ;;  %v3950_v8 = vsel %vm390_vm0, %v3931_v4, 0 }
   0xf   : > { %3799 = vmatprep.subr.msk.bf16.mxu1 %vm390_vm0, %v3141_v2  ;;  %3800 = vmatprep.subr.msk.bf16.mxu0 %vm390_vm0, %v3190_v3  ;;  %s3807_s26 = smul.u32 216, %s5709_s12  ;;  %v3954_v9 = vsel %vm390_vm0, %v3936_v5, 0  ;;  %vm587_vm2 = vsmask.f32 3328  ;;  %vm588_vm3 = vsmask.f32 7440 }
  0x10   : > { %vm1284_vm4 = vcmask 1042432   ;;  %vm1285_vm5 = vcmask 1046532   ;;  %vm4131_vm6 = vmor %vm587_vm2, %vm588_vm3  ;;  %v5527_v41 = vmov 0  ;;  %s3335_s17 = sshll.u32 %s5709_s12, 8 }
  0x11   : > { %s3942_s29 = scalar_lea.vmem %s5475_s0, %s3807_s26  ;;  %vm4158_vm7 = vmor %vm1284_vm4, %vm1285_vm5  ;;  %s5346_s20 = scalar_lea.vmem %s5478_s3, %s3335_s17 }
  0x12   : > { %v3957_v10 = vld [vmem:[%s3942_s29] sm:$0xf]  ;;  %v3960_v11 = vld [vmem:[%s3942_s29 + $0x4] sm:$0xf]  ;;  %v3981_v22 = vld [vmem:[%s3942_s29 + $0xc] sm:$0xf] }
  0x13   : > { %v3963_v12 = vld [vmem:[%s3942_s29 + $0x60] sm:$0xf]  ;;  %v3109_v13 = vcombine.low %v3957_v10, %v3960_v11  ;;  %v591_v14 = vshrl.u32 %v3957_v10, 16  ;;  %v594_v15 = vshll.u32 %v3957_v10, 16  ;;  %v600_v16 = vshll.u32 %v3960_v11, 16 }
  0x14   : > { %v3971_v17 = vld [vmem:[%s3942_s29 + $0x64] sm:$0xf]  ;;  %v604_v18 = vshrl.u32 %v3960_v11, 16  ;;  %v3174_v19 = vrot.slane %v3957_v10, 9  ;;  %v1289_v20 = vrot.slane %v3960_v11, 5  ;;  %v783_v26 = vshrl.u32 %v3963_v12, 16 }
  0x15   : > { %v3978_v21 = vcombine.low %v3963_v12, %v3971_v17  ;;  %3491 = vmatprep.mubr.msk.bf16.mxu0 %vm341_vm1, %v3109_v13  ;;  %v593_v23 = vrot.slane %v591_v14, 4  ;;  %v596_v24 = vrot.slane %v594_v15, 5  ;;  %v3984_v25 = vrot.slane %v600_v16, 5  ;;  %v3988_v27 = vld [vmem:[%s3942_s29 + $0x10] sm:$0xf] }
  0x16   : > { %v606_v28 = vrot.slane %v604_v18, 4  ;;  %v3992_v29 = vrot.slane %v1289_v20, 4  ;;  %v786_v30 = vshll.u32 %v3963_v12, 16  ;;  %v792_v31 = vshll.u32 %v3971_v17, 16  ;;  %v3999_v32 = vld [vmem:[%s3942_s29 + $0x6c] sm:$0xf] }
  0x17   : > { %5515 = vst [vmem:[#allocation2_spill] sm:$0xff] %v3978_v21  ;;  %3507 = vmatprep.mubr.msk.bf16.mxu1 %vm341_vm1, %v3978_v21  ;;  %v597_v33 = vor.u32 %v596_v24, %v593_v23  ;;  %v4001_v34 = vrot.slane %v783_v26, 4  ;;  %v796_v35 = vshrl.u32 %v3971_v17, 16  ;;  %v4006_v37 = vld [vmem:[%s3942_s29 + $0x70] sm:$0xf]  ;;  %v4023_v45 = vcombine.low %v3981_v22, %v3988_v27 }
  0x18   : > { %v607_v38 = vor.u32 %v606_v28, %v3984_v25  ;;  %v4009_v39 = vrot.slane %v786_v30, 5  ;;  %v4011_v40 = vrot.slane %v792_v31, 5  ;;  %v4015_v42 = vld [vmem:[%s3942_s29 + $0x18] sm:$0xf]  ;;  %v615_v46 = vshrl.u32 %v3981_v22, 16 }
  0x19   : > { %v4017_v43 = vrot.slane %v597_v33, 4  ;;  %v4019_v44 = vrot.slane %v796_v35, 4  ;;  %5516 = vst [vmem:[#allocation3_spill] sm:$0xff] %v4023_v45  ;;  %v4027_v47 = vld [vmem:[%s3942_s29 + $0x1c] sm:$0xf]  ;;  %v618_v49 = vshll.u32 %v3981_v22, 16  ;;  %3492 = vmatmul.mubr.msk.bf16.vlgmr.msra.gmra.mxu0 %vm341_vm1, %v4023_v45  ;;  %v4043_v56 = vcombine.low %v3999_v32, %v4006_v37 }
  0x1a   : > { %v4029_v48 = vrot.slane %v607_v38, 4  ;;  %v624_v50 = vshll.u32 %v3988_v27, 16  ;;  %v628_v51 = vshrl.u32 %v3988_v27, 16  ;;  %v4035_v52 = vld [vmem:[%s3942_s29 + $0x78] sm:$0xf]  ;;  %v617_v53 = vrot.slane %v615_v46, 4  ;;  %3558 = vmatpush3.bf16.msra.mxu0 %v1498_v7 }
  0x1b   : > { %v3175_v54 = vrot.slane %v3981_v22, 9  ;;  %v1296_v55 = vrot.slane %v3988_v27, 5  ;;  %5517 = vst [vmem:[#allocation4_spill] sm:$0xff] %v4043_v56  ;;  %v4046_v57 = vld [vmem:[%s3942_s29 + $0x7c] sm:$0xf]  ;;  %v620_v58 = vrot.slane %v618_v49, 5  ;;  %3508 = vmatmul.mubr.msk.bf16.vlgmr.msra.gmra.mxu1 %vm341_vm1, %v4043_v56  ;;  %v4064_v2 = vcombine.low %v4015_v42, %v4027_v47  ;;  %3802 = vmatprep.subr.msk.bf16.mxu0 %vm390_vm0, %v3936_v5 }
  0x1c   : > { %v4048_v59 = vrot.slane %v624_v50, 5  ;;  %v630_v60 = vrot.slane %v628_v51, 4  ;;  %v4052_v62 = vld [vmem:[%s3942_s29 + $0x24] sm:$0xf]  ;;  %v4067_v3 = vld [vmem:[%s3942_s29 + $0x28] sm:$0xf]  ;;  %3524 = vmatpush3.bf16.msra.mxu1 %v3945_v6  ;;  %v4086_v5 = vcombine.low %v4035_v52, %v4046_v57  ;;  %v4206_v6 = vsel %vm4158_vm7, %v3174_v19, %v1289_v20 }
  0x1d   : > { %v4056_v63 = vrot.slane %v1296_v55, 4  ;;  %5518 = vst [vmem:[#allocation5_spill] sm:$0xff] %v4064_v2  ;;  %v621_v7 = vor.u32 %v620_v58, %v617_v53  ;;  %v639_v14 = vshrl.u32 %v4015_v42, 16  ;;  %v4076_v16 = vld [vmem:[%s3942_s29 + $0x84] sm:$0xf]  ;;  %3495 = vmatprep.mubr.msk.bf16.mxu0 %vm341_vm1, %v4064_v2  ;;  %3801 = vmatprep.subr.msk.bf16.mxu1 %vm390_vm0, %v3931_v4  ;;  %v4102_v33 = vcombine.low %v4052_v62, %v4067_v3 }
  0x1e   : > { %v631_v13 = vor.u32 %v630_v60, %v4048_v59  ;;  %v4079_v18 = vld [vmem:[%s3942_s29 + $0x88] sm:$0xf]  ;;  %5519 = vst [vmem:[#allocation6_spill] sm:$0xff] %v4086_v5  ;;  %v4091_v26 = vld [vmem:[%s3942_s29 + $0x30] sm:$0xf]  ;;  %3511 = vmatprep.mubr.msk.bf16.mxu1 %vm341_vm1, %v4086_v5  ;;  %v5528_v41 = vsel %vm4158_vm7, 4294967295, %v5527_v41  ;;  %v603_v58 = vsel %vm4131_vm6, %v4017_v43, %v3984_v25  ;;  %v1297_v10 = vsel %vm4158_vm7, %v3175_v54, %v1296_v55 }
  0x1f   : > { %v4095_v28 = vrot.slane %v621_v7, 4  ;;  %5520 = vst [vmem:[#allocation7_spill] sm:$0xff] %v4102_v33  ;;  %v4105_v35 = vld [vmem:[%s3942_s29 + $0x34] sm:$0xf]  ;;  %v4114_v49 = vcombine.low %v4076_v16, %v4079_v18  ;;  %v4117_v50 = vld [vmem:[%s3942_s29 + $0x90] sm:$0xf] }
  0x20   : > { %v4097_v30 = vrot.slane %v631_v13, 4  ;;  %v4124_v60 = vcombine.low %v4091_v26, %v4105_v35  ;;  %v4127_v7 = vld [vmem:[%s3942_s29 + $0x94] sm:$0xf]  ;;  %v5523_v13 = vmov 0  ;;  %v4145_v24 = vld [vmem:[%s3942_s29 + $0x3c] sm:$0xf] }
  0x21   : > { %5521 = vst [vmem:[#allocation8_spill] sm:$0xff] %v4114_v49  ;;  %v5524_v13 = vsel %vm4131_vm6, 4294967295, %v5523_v13  ;;  %3496 = vmatmul.mubr.msk.bf16.gmra.mxu0 %vm341_vm1, %v4102_v33  ;;  %v4142_v31 = vcombine.low %v4117_v50, %v4127_v7  ;;  %v4153_v61 = vld [vmem:[%s3942_s29 + $0x40] sm:$0xf]  ;;  %5529 = vst [vmem:[#allocation12_spill] sm:$0xff] %v5528_v41  ;;  %v627_v46 = vsel %vm4131_vm6, %v4095_v28, %v4048_v59  ;;  %v641_v19 = vrot.slane %v639_v14, 4 }
  0x22   : > { %5522 = vst [vmem:[#allocation9_spill] sm:$0xff] %v4124_v60  ;;  %5525 = vst [vmem:[#allocation10_spill] sm:$0xff] %v5524_v13  ;;  %3499 = vmatprep.mubr.msk.bf16.mxu0 %vm341_vm1, %v4124_v60  ;;  %v4166_v1 = vcombine.low %v4145_v24, %v4153_v61  ;;  %v4171_v53 = vld [vmem:[%s3942_s29 + $0x9c] sm:$0xf]  ;;  %v4174_v36 = vld [vmem:[%s3942_s29 + $0xa0] sm:$0xf] }
  0x23   : > { %5526 = vst [vmem:[#allocation11_spill] sm:$0xff] %v4142_v31  ;;  %3512 = vmatmul.mubr.msk.bf16.gmra.mxu1 %vm341_vm1, %v4114_v49  ;;  %v4184_v51 = vcombine.low %v4171_v53, %v4174_v36  ;;  %v4190_v4 = vld [vmem:[%s3942_s29 + $0x48] sm:$0xf]  ;;  %v4193_v38 = vld [vmem:[%s3942_s29 + $0x4c] sm:$0xf]  ;;  %v5535_v15 = vshll.u32 %v4015_v42, 16 }
  0x24   : > { %5530 = vst [vmem:[#allocation13_spill] sm:$0xff] %v4166_v1  ;;  %3515 = vmatprep.mubr.msk.bf16.mxu1 %vm341_vm1, %v4142_v31  ;;  %v4198_v23 = vld [vmem:[%s3942_s29 + $0xa8] sm:$0xf]  ;;  %v4214_v0 = vcombine.low %v4190_v4, %v4193_v38  ;;  %v4218_v11 = vld [vmem:[%s3942_s29 + $0xac] sm:$0xf]  ;;  %v5536_v49 = vshrl.u32 %v4027_v47, 16 }
  0x25   : > { %5531 = vst [vmem:[#allocation14_spill] sm:$0xff] %v4184_v51  ;;  %v4224_v20 = vcombine.low %v4198_v23, %v4218_v11  ;;  %v4228_v28 = vld [vmem:[%s3942_s29 + $0x54] sm:$0xf]  ;;  %v4231_v25 = vld [vmem:[%s3942_s29 + $0x58] sm:$0xf] }
  0x26   : > { %5532 = vst [vmem:[#allocation15_spill] sm:$0xff] %v4214_v0  ;;  %v4243_v43 = vcombine.low %v4228_v28, %v4231_v25  ;;  %v4249_v27 = vld [vmem:[%s3942_s29 + $0xb4] sm:$0xf]  ;;  %v4254_v22 = vld [vmem:[%s3942_s29 + $0xb8] sm:$0xf]  ;;  %v654_v33 = vrot.slane %v5536_v49, 4 }
  0x27   : > { %5533 = vst [vmem:[#allocation16_spill] sm:$0xff] %v4224_v20  ;;  %5534 = vst [vmem:[#allocation17_spill] sm:$0xff] %v4254_v22  ;;  %v201_v14 = vld [vmem:[%s3942_s29 + $0x8] sm:$0x1]  ;;  %v4267_v31 = vcombine.low %v4249_v27, %v4254_v22  ;;  %v204_v56 = vld [vmem:[%s3942_s29 + $0x14] sm:$0x1] }
  0x28   : > { %v610_v5 = vshll.u32 %v201_v14, 16  ;;  %v1292_v54 = vrot.slane %v201_v14, 5  ;;  %v634_v55 = vshll.u32 %v204_v56, 16  ;;  %v1299_v59 = vrot.slane %v204_v56, 5  ;;  %v207_v21 = vld [vmem:[%s3942_s29 + $0x20] sm:$0x1] }
  0x29   : > { %3500 = vmatmul.mubr.msk.bf16.gmra.mxu0 %vm341_vm1, %v4166_v1  ;;  %v644_v1 = vrot.slane %v5535_v15, 5 }
  0x2a   : > { %3503 = vmatprep.mubr.msk.bf16.mxu0 %vm341_vm1, %v4214_v0  ;;  %v648_v0 = vshll.u32 %v4027_v47, 16  ;;  %v612_v60 = vrot.slane %v610_v5, 5  ;;  %v1293_v14 = vsel %vm4158_vm7, %v3992_v29, %v1292_v54  ;;  %v636_v2 = vrot.slane %v634_v55, 5 }
  0x2b   : > { %3516 = vmatmul.mubr.msk.bf16.gmra.mxu1 %vm341_vm1, %v4184_v51  ;;  %v658_v51 = vshll.u32 %v207_v21, 16  ;;  %v3191_v56 = vcombine.low %v4206_v6, %v1293_v14  ;;  %v1300_v15 = vsel %vm4158_vm7, %v4056_v63, %v1299_v59  ;;  %v645_v45 = vor.u32 %v644_v1, %v641_v19  ;;  %v210_v59 = vld [vmem:[%s3942_s29 + $0x2c] sm:$0x1] }
  0x2c   : > { %3519 = vmatprep.mubr.msk.bf16.mxu1 %vm341_vm1, %v4224_v20  ;;  %v613_v5 = vsel %vm4131_vm6, %v4029_v48, %v612_v60  ;;  %v4291_v20 = vcombine.low %v1297_v10, %v1300_v15  ;;  %v650_v29 = vrot.slane %v648_v0, 5  ;;  %v637_v6 = vsel %vm4131_vm6, %v4097_v30, %v636_v2 }
  0x2d   : > { %v660_v54 = vrot.slane %v658_v51, 5  ;;  %v3142_v22 = vcombine.low %v603_v58, %v613_v5  ;;  %v646_v49 = vrot.slane %v645_v45, 4  ;;  %v3176_v55 = vrot.slane %v4015_v42, 9 }
  0x2e   : > { %v4297_v14 = vcombine.low %v627_v46, %v637_v6  ;;  %v655_v63 = vor.u32 %v654_v33, %v650_v29  ;;  %v1303_v1 = vrot.slane %v4027_v47, 5  ;;  %v1306_v19 = vrot.slane %v207_v21, 5 }
  0x2f   : > { %v651_v48 = vsel %vm4131_vm6, %v646_v49, %v650_v29  ;;  %v5537_v0 = vshrl.u32 %v4052_v62, 16  ;;  %v5538_v45 = vshll.u32 %v4052_v62, 16  ;;  %v672_v42 = vshll.u32 %v4067_v3, 16 }
  0x30   : > { %v656_v30 = vrot.slane %v655_v63, 4  ;;  %v1304_v21 = vsel %vm4158_vm7, %v3176_v55, %v1303_v1  ;;  %v1305_v47 = vrot.slane %v1303_v1, 4  ;;  %v5539_v33 = vshrl.u32 %v4067_v3, 16 }
  0x31   : > { %3504 = vmatmul.mubr.msk.bf16.gmra.mxu0 %vm341_vm1, %v4243_v43  ;;  %v665_v51 = vrot.slane %v5537_v0, 4  ;;  %v668_v2 = vrot.slane %v5538_v45, 5  ;;  %v674_v60 = vrot.slane %v672_v42, 5  ;;  %v682_v10 = vshll.u32 %v210_v59, 16  ;;  %v213_v0 = vld [vmem:[%s3942_s29 + $0x38] sm:$0x1] }
  0x32   : > { %3559 = vmatprep.mubr.msk.bf16.mxu0 %vm341_vm1, %v3191_v56  ;;  %v678_v46 = vrot.slane %v5539_v33, 4  ;;  %v3177_v15 = vrot.slane %v4052_v62, 9  ;;  %v661_v56 = vsel %vm4131_vm6, %v656_v30, %v660_v54  ;;  %v1307_v5 = vsel %vm4158_vm7, %v1305_v47, %v1306_v19 }
  0x33   : > { %3520 = vmatmul.mubr.msk.bf16.gmra.mxu1 %vm341_vm1, %v4267_v31  ;;  %v669_v58 = vor.u32 %v668_v2, %v665_v51  ;;  %v1310_v29 = vrot.slane %v4067_v3, 5  ;;  %v1313_v6 = vrot.slane %v210_v59, 5  ;;  %v4324_v49 = vcombine.low %v651_v48, %v661_v56  ;;  %v4357_v56 = vld [vmem:[%s5476_s1 + $0xa] sm:$0x3] }
  0x34   : > { %3525 = vmatprep.mubr.msk.bf16.mxu1 %vm341_vm1, %v3142_v22  ;;  %v4326_v55 = vcombine.low %v1304_v21, %v1307_v5  ;;  %v679_v1 = vor.u32 %v678_v46, %v674_v60  ;;  %v684_v51 = vrot.slane %v682_v10, 5  ;;  %v5540_v54 = vshrl.u32 %v4091_v26, 16  ;;  %v4346_v46 = vld [vmem:[%s5476_s1 + $0xc] sm:$0x3] }
  0x35   : > { %v670_v63 = vrot.slane %v669_v58, 4  ;;  %v1311_v62 = vsel %vm4158_vm7, %v3177_v15, %v1310_v29  ;;  %v1312_v22 = vrot.slane %v1310_v29, 4  ;;  %v5541_v59 = vshll.u32 %v4091_v26, 16 }
  0x36   : > { %v689_v45 = vrot.slane %v5540_v54, 4  ;;  %v680_v3 = vrot.slane %v679_v1, 4  ;;  %v696_v2 = vshll.u32 %v4105_v35, 16  ;;  %v5542_v30 = vshrl.u32 %v4105_v35, 16 }
  0x37   : > { %v675_v19 = vsel %vm4131_vm6, %v670_v63, %v674_v60  ;;  %v692_v48 = vrot.slane %v5541_v59, 5  ;;  %v1314_v42 = vsel %vm4158_vm7, %v1312_v22, %v1313_v6  ;;  %v706_v47 = vshll.u32 %v213_v0, 16  ;;  %v216_v63 = vld [vmem:[%s3942_s29 + $0x44] sm:$0x1] }
  0x38   : > { %v702_v21 = vrot.slane %v5542_v30, 4  ;;  %v3178_v33 = vrot.slane %v4091_v26, 9  ;;  %v685_v58 = vsel %vm4131_vm6, %v680_v3, %v684_v51  ;;  %v4352_v60 = vcombine.low %v1311_v62, %v1314_v42 }
  0x39   : > { %3560 = vmatmul.mubr.msk.bf16.vlgmr.msra.gmra.mxu0 %vm341_vm1, %v4291_v20  ;;  %v693_v10 = vor.u32 %v692_v48, %v689_v45  ;;  %v698_v15 = vrot.slane %v696_v2, 5  ;;  %v4362_v26 = vcombine.low %v675_v19, %v685_v58  ;;  %v708_v5 = vrot.slane %v706_v47, 5 }
  0x3a   : > { %3626 = vmatpush3.bf16.msra.mxu0 %v3954_v9  ;;  %3563 = vmatprep.mubr.msk.bf16.mxu0 %vm341_vm1, %v4326_v55  ;;  %v1317_v29 = vrot.slane %v4105_v35, 5  ;;  %v1320_v6 = vrot.slane %v213_v0, 5  ;;  %v5543_v62 = vshrl.u32 %v4145_v24, 16  ;;  %v5544_v9 = vshll.u32 %v4145_v24, 16 }
  0x3b   : > { %3526 = vmatmul.mubr.msk.bf16.vlgmr.msra.gmra.mxu1 %vm341_vm1, %v4297_v14  ;;  %v694_v1 = vrot.slane %v693_v10, 4  ;;  %v703_v51 = vor.u32 %v702_v21, %v698_v15  ;;  %3804 = vmatprep.subr.msk.bf16.mxu0 %vm390_vm0, %v4346_v46  ;;  %v720_v45 = vshll.u32 %v4153_v61, 16  ;;  %v5545_v19 = vshrl.u32 %v4153_v61, 16 }
  0x3c   : > { %v713_v22 = vrot.slane %v5543_v62, 4  ;;  %v716_v54 = vrot.slane %v5544_v9, 5  ;;  %3592 = vmatpush3.bf16.msra.mxu1 %v3950_v8  ;;  %3529 = vmatprep.mubr.msk.bf16.mxu1 %vm341_vm1, %v4324_v49  ;;  %v1318_v35 = vsel %vm4158_vm7, %v3178_v33, %v1317_v29  ;;  %v1319_v0 = vrot.slane %v1317_v29, 4  ;;  %v219_v29 = vld [vmem:[%s3942_s29 + $0x50] sm:$0x1] }
  0x3d   : > { %v726_v3 = vrot.slane %v5545_v19, 4  ;;  %v699_v59 = vsel %vm4131_vm6, %v694_v1, %v698_v15  ;;  %v704_v48 = vrot.slane %v703_v51, 4  ;;  %v730_v42 = vshll.u32 %v216_v63, 16  ;;  %3803 = vmatprep.subr.msk.bf16.mxu1 %vm390_vm0, %v4357_v56 }
  0x3e   : > { %v717_v2 = vor.u32 %v716_v54, %v713_v22  ;;  %v1321_v8 = vsel %vm4158_vm7, %v1319_v0, %v1320_v6  ;;  %v722_v30 = vrot.slane %v720_v45, 5  ;;  %v3179_v21 = vrot.slane %v4145_v24, 9 }
  0x3f   : > { %v1324_v47 = vrot.slane %v4153_v61, 5  ;;  %v709_v33 = vsel %vm4131_vm6, %v704_v48, %v708_v5  ;;  %v4392_v58 = vcombine.low %v1318_v35, %v1321_v8  ;;  %v732_v15 = vrot.slane %v730_v42, 5 }
  0x40   : > { %v718_v10 = vrot.slane %v717_v2, 4  ;;  %v4395_v1 = vcombine.low %v699_v59, %v709_v33  ;;  %v727_v51 = vor.u32 %v726_v3, %v722_v30  ;;  %v1327_v24 = vrot.slane %v216_v63, 5 }
  0x41   : > { %v1325_v62 = vsel %vm4158_vm7, %v3179_v21, %v1324_v47  ;;  %v1326_v6 = vrot.slane %v1324_v47, 4  ;;  %3564 = vmatmul.mubr.msk.bf16.gmra.mxu0 %vm341_vm1, %v4352_v60  ;;  %v5546_v5 = vshrl.u32 %v4190_v4, 16  ;;  %v5547_v9 = vshll.u32 %v4190_v4, 16  ;;  %v222_v47 = vld [vmem:[%s3942_s29 + $0x5c] sm:$0x1] }
  0x42   : > { %v723_v61 = vsel %vm4131_vm6, %v718_v10, %v722_v30  ;;  %3567 = vmatprep.mubr.msk.bf16.mxu0 %vm341_vm1, %v4392_v58  ;;  %v728_v35 = vrot.slane %v727_v51, 4  ;;  %v744_v0 = vshll.u32 %v4193_v38, 16  ;;  %v5548_v45 = vshrl.u32 %v4193_v38, 16 }
  0x43   : > { %v737_v22 = vrot.slane %v5546_v5, 4  ;;  %v740_v54 = vrot.slane %v5547_v9, 5  ;;  %v754_v3 = vshll.u32 %v219_v29, 16  ;;  %3530 = vmatmul.mubr.msk.bf16.gmra.mxu1 %vm341_vm1, %v4362_v26  ;;  %v1328_v63 = vsel %vm4158_vm7, %v1326_v6, %v1327_v24 }
  0x44   : > { %v750_v19 = vrot.slane %v5548_v45, 4  ;;  %v3180_v48 = vrot.slane %v4190_v4, 9  ;;  %v1331_v2 = vrot.slane %v4193_v38, 5  ;;  %3533 = vmatprep.mubr.msk.bf16.mxu1 %vm341_vm1, %v4395_v1  ;;  %v733_v42 = vsel %vm4131_vm6, %v728_v35, %v732_v15 }
  0x45   : > { %v741_v59 = vor.u32 %v740_v54, %v737_v22  ;;  %v4422_v8 = vcombine.low %v1325_v62, %v1328_v63  ;;  %v746_v30 = vrot.slane %v744_v0, 5  ;;  %v756_v21 = vrot.slane %v754_v3, 5 }
  0x46   : > { %v4425_v33 = vcombine.low %v723_v61, %v733_v42  ;;  %v1332_v51 = vsel %vm4158_vm7, %v3180_v48, %v1331_v2  ;;  %v1333_v4 = vrot.slane %v1331_v2, 4  ;;  %v1334_v38 = vrot.slane %v219_v29, 5  ;;  %v225_v2 = vld [vmem:[%s3942_s29 + $0x68] sm:$0x1] }
  0x47   : > { %v742_v10 = vrot.slane %v741_v59, 4  ;;  %v751_v6 = vor.u32 %v750_v19, %v746_v30  ;;  %v5549_v24 = vshrl.u32 %v4228_v28, 16  ;;  %v5550_v15 = vshll.u32 %v4228_v28, 16 }
  0x48   : > { %v768_v61 = vshll.u32 %v4231_v25, 16  ;;  %v5551_v9 = vshrl.u32 %v4231_v25, 16  ;;  %v778_v35 = vshll.u32 %v222_v47, 16  ;;  %v1335_v29 = vsel %vm4158_vm7, %v1333_v4, %v1334_v38 }
  0x49   : > { %v761_v5 = vrot.slane %v5549_v24, 4  ;;  %v764_v62 = vrot.slane %v5550_v15, 5  ;;  %v747_v22 = vsel %vm4131_vm6, %v742_v10, %v746_v30  ;;  %v752_v0 = vrot.slane %v751_v6, 4  ;;  %3568 = vmatmul.mubr.msk.bf16.gmra.mxu0 %vm341_vm1, %v4422_v8 }
  0x4a   : > { %v774_v54 = vrot.slane %v5551_v9, 4  ;;  %v3181_v19 = vrot.slane %v4228_v28, 9  ;;  %v4443_v3 = vcombine.low %v1332_v51, %v1335_v29  ;;  %v770_v63 = vrot.slane %v768_v61, 5 }
  0x4b   : > { %v765_v45 = vor.u32 %v764_v62, %v761_v5  ;;  %v780_v59 = vrot.slane %v778_v35, 5  ;;  %v1338_v48 = vrot.slane %v4231_v25, 5  ;;  %v757_v42 = vsel %vm4131_vm6, %v752_v0, %v756_v21  ;;  %3534 = vmatmul.mubr.msk.bf16.gmra.mxu1 %vm341_vm1, %v4425_v33 }
  0x4c   : > { %v1341_v10 = vrot.slane %v222_v47, 5  ;;  %v5552_v4 = vor.u32 %v4009_v39, %v4001_v34  ;;  %v4454_v28 = vcombine.low %v747_v22, %v757_v42  ;;  %3571 = vmatprep.mubr.msk.bf16.mxu0 %vm341_vm1, %v4443_v3  ;;  %v775_v25 = vor.u32 %v774_v54, %v770_v63 }
  0x4d   : > { %v766_v30 = vrot.slane %v765_v45, 4  ;;  %v1339_v51 = vsel %vm4158_vm7, %v3181_v19, %v1338_v48  ;;  %v1340_v21 = vrot.slane %v1338_v48, 4  ;;  %v5553_v39 = vor.u32 %v4019_v44, %v4011_v40 }
  0x4e   : > { %v790_v6 = vrot.slane %v5552_v4, 4  ;;  %v802_v24 = vshll.u32 %v225_v2, 16  ;;  %3537 = vmatprep.mubr.msk.bf16.mxu1 %vm341_vm1, %v4454_v28  ;;  %v776_v5 = vrot.slane %v775_v25, 4  ;;  %v5554_v62 = vrot.slane %v3971_v17, 5 }
  0x4f   : > { %v771_v47 = vsel %vm4131_vm6, %v766_v30, %v770_v63  ;;  %v800_v38 = vrot.slane %v5553_v39, 4  ;;  %v1342_v15 = vsel %vm4158_vm7, %v1340_v21, %v1341_v10  ;;  %v5555_v22 = vrot.slane %v3963_v12, 9 }
  0x50   : > { %v795_v34 = vsel %vm4131_vm6, %v790_v6, %v4011_v40  ;;  %v5556_v9 = vmov %v5554_v62  ;;  %v228_v40 = vld [vmem:[%s3942_s29 + $0x74] sm:$0x1]  ;;  %v4481_v44 = vcombine.low %v1339_v51, %v1342_v15  ;;  %v804_v35 = vrot.slane %v802_v24, 5 }
  0x51   : > { %v1346_v61 = vsel %vm4158_vm7, %v5555_v22, %v5554_v62  ;;  %v1347_v54 = vrot.slane %v5556_v9, 4  ;;  %v1348_v0 = vrot.slane %v225_v2, 5  ;;  %v5557_v29 = vshrl.u32 %v3999_v32, 16 }
  0x52   : > { %v781_v19 = vsel %vm4131_vm6, %v776_v5, %v780_v59  ;;  %v5558_v63 = vshll.u32 %v3999_v32, 16  ;;  %v816_v48 = vshll.u32 %v4006_v37, 16  ;;  %v5559_v17 = vshrl.u32 %v4006_v37, 16  ;;  %3572 = vmatmul.mubr.msk.bf16.gmra.mxu0 %vm341_vm1, %v4481_v44 }
  0x53   : > { %v809_v45 = vrot.slane %v5557_v29, 4  ;;  %v4492_v30 = vcombine.low %v771_v47, %v781_v19  ;;  %v805_v2 = vsel %vm4131_vm6, %v800_v38, %v804_v35  ;;  %v1349_v10 = vsel %vm4158_vm7, %v1347_v54, %v1348_v0  ;;  %v231_v38 = vld [vmem:[%s3942_s29 + $0x80] sm:$0x1] }
  0x54   : > { %v812_v12 = vrot.slane %v5558_v63, 5  ;;  %v822_v42 = vrot.slane %v5559_v17, 4  ;;  %v826_v4 = vshll.u32 %v228_v40, 16  ;;  %v4500_v59 = vcombine.low %v795_v34, %v805_v2 }
  0x55   : > { %v4502_v6 = vcombine.low %v1346_v61, %v1349_v10  ;;  %v818_v51 = vrot.slane %v816_v48, 5  ;;  %v3183_v47 = vrot.slane %v3999_v32, 9  ;;  %v1352_v39 = vrot.slane %v4006_v37, 5  ;;  %3538 = vmatmul.mubr.msk.bf16.gmra.mxu1 %vm341_vm1, %v4492_v30 }
  0x56   : > { %v813_v25 = vor.u32 %v812_v12, %v809_v45  ;;  %v828_v21 = vrot.slane %v826_v4, 5  ;;  %v1355_v24 = vrot.slane %v228_v40, 5  ;;  %v5560_v15 = vshrl.u32 %v4035_v52, 16  ;;  %3541 = vmatprep.mubr.msk.bf16.mxu1 %vm341_vm1, %v4500_v59  ;;  %v234_v4 = vld [vmem:[%s3942_s29 + $0x8c] sm:$0x1] }
  0x57   : > { %3575 = vmatprep.mubr.msk.bf16.mxu0 %vm341_vm1, %v4502_v6  ;;  %v823_v34 = vor.u32 %v822_v42, %v818_v51  ;;  %v5561_v22 = vshll.u32 %v4035_v52, 16  ;;  %v1353_v32 = vsel %vm4158_vm7, %v3183_v47, %v1352_v39  ;;  %v1354_v37 = vrot.slane %v1352_v39, 4 }
  0x58   : > { %v814_v5 = vrot.slane %v813_v25, 4  ;;  %v833_v62 = vrot.slane %v5560_v15, 4  ;;  %v840_v9 = vshll.u32 %v4046_v57, 16  ;;  %v5562_v54 = vshrl.u32 %v4046_v57, 16 }
  0x59   : > { %v836_v61 = vrot.slane %v5561_v22, 5  ;;  %v824_v0 = vrot.slane %v823_v34, 4  ;;  %v850_v45 = vshll.u32 %v231_v38, 16  ;;  %v1356_v19 = vsel %vm4158_vm7, %v1354_v37, %v1355_v24 }
  0x5a   : > { %v846_v40 = vrot.slane %v5562_v54, 4  ;;  %v819_v35 = vsel %vm4131_vm6, %v814_v5, %v818_v51  ;;  %v842_v63 = vrot.slane %v840_v9, 5  ;;  %v3184_v12 = vrot.slane %v4035_v52, 9 }
  0x5b   : > { %v837_v29 = vor.u32 %v836_v61, %v833_v62  ;;  %v1359_v48 = vrot.slane %v4046_v57, 5  ;;  %v829_v17 = vsel %vm4131_vm6, %v824_v0, %v828_v21  ;;  %v4530_v42 = vcombine.low %v1353_v32, %v1356_v19 }
  0x5c   : > { %v852_v10 = vrot.slane %v850_v45, 5  ;;  %v4533_v25 = vcombine.low %v819_v35, %v829_v17  ;;  %v847_v51 = vor.u32 %v846_v40, %v842_v63  ;;  %v1362_v57 = vrot.slane %v231_v38, 5  ;;  %v237_v45 = vld [vmem:[%s3942_s29 + $0x98] sm:$0x1] }
  0x5d   : > { %v838_v2 = vrot.slane %v837_v29, 4  ;;  %v1360_v47 = vsel %vm4158_vm7, %v3184_v12, %v1359_v48  ;;  %v1361_v39 = vrot.slane %v1359_v48, 4  ;;  %3576 = vmatmul.mubr.msk.bf16.gmra.mxu0 %vm341_vm1, %v4530_v42  ;;  %v5563_v21 = vshrl.u32 %v4076_v16, 16 }
  0x5e   : > { %v5564_v5 = vshll.u32 %v4076_v16, 16  ;;  %v848_v15 = vrot.slane %v847_v51, 4  ;;  %v864_v62 = vshll.u32 %v4079_v18, 16  ;;  %v5565_v22 = vshrl.u32 %v4079_v18, 16  ;;  %3542 = vmatmul.mubr.msk.bf16.gmra.mxu1 %vm341_vm1, %v4533_v25 }
  0x5f   : > { %v843_v52 = vsel %vm4131_vm6, %v838_v2, %v842_v63  ;;  %v857_v24 = vrot.slane %v5563_v21, 4  ;;  %v874_v32 = vshll.u32 %v234_v4, 16  ;;  %v1363_v38 = vsel %vm4158_vm7, %v1361_v39, %v1362_v57 }
  0x60   : > { %v860_v34 = vrot.slane %v5564_v5, 5  ;;  %v870_v61 = vrot.slane %v5565_v22, 4  ;;  %v3185_v9 = vrot.slane %v4076_v16, 9  ;;  %v1366_v54 = vrot.slane %v4079_v18, 5 }
  0x61   : > { %v853_v40 = vsel %vm4131_vm6, %v848_v15, %v852_v10  ;;  %v4556_v35 = vcombine.low %v1360_v47, %v1363_v38  ;;  %v866_v0 = vrot.slane %v864_v62, 5  ;;  %v876_v29 = vrot.slane %v874_v32, 5 }
  0x62   : > { %v861_v37 = vor.u32 %v860_v34, %v857_v24  ;;  %v4559_v19 = vcombine.low %v843_v52, %v853_v40  ;;  %v1367_v12 = vsel %vm4158_vm7, %v3185_v9, %v1366_v54  ;;  %v1368_v48 = vrot.slane %v1366_v54, 4  ;;  %v240_v9 = vld [vmem:[%s3942_s29 + $0xa4] sm:$0x1] }
  0x63   : > { %3579 = vmatprep.mubr.msk.bf16.mxu0 %vm341_vm1, %v4556_v35  ;;  %v871_v16 = vor.u32 %v870_v61, %v866_v0  ;;  %v1369_v18 = vrot.slane %v234_v4, 5  ;;  %v5566_v17 = vshrl.u32 %v4117_v50, 16  ;;  %v5567_v10 = vshll.u32 %v4117_v50, 16 }
  0x64   : > { %v862_v63 = vrot.slane %v861_v37, 4  ;;  %3545 = vmatprep.mubr.msk.bf16.mxu1 %vm341_vm1, %v4559_v19  ;;  %v888_v39 = vshll.u32 %v4127_v7, 16  ;;  %v5568_v52 = vshrl.u32 %v4127_v7, 16  ;;  %v898_v21 = vshll.u32 %v237_v45, 16 }
  0x65   : > { %v881_v2 = vrot.slane %v5566_v17, 4  ;;  %v884_v51 = vrot.slane %v5567_v10, 5  ;;  %v872_v4 = vrot.slane %v871_v16, 4  ;;  %v1370_v24 = vsel %vm4158_vm7, %v1368_v48, %v1369_v18 }
  0x66   : > { %v867_v47 = vsel %vm4131_vm6, %v862_v63, %v866_v0  ;;  %v894_v57 = vrot.slane %v5568_v52, 4  ;;  %v3186_v34 = vrot.slane %v4117_v50, 9  ;;  %v4579_v15 = vcombine.low %v1367_v12, %v1370_v24 }
  0x67   : > { %v885_v5 = vor.u32 %v884_v51, %v881_v2  ;;  %v890_v62 = vrot.slane %v888_v39, 5  ;;  %v900_v22 = vrot.slane %v898_v21, 5  ;;  %v1373_v61 = vrot.slane %v4127_v7, 5 }
  0x68   : > { %v877_v32 = vsel %vm4131_vm6, %v872_v4, %v876_v29  ;;  %v1376_v37 = vrot.slane %v237_v45, 5  ;;  %v5569_v54 = vshrl.u32 %v4171_v53, 16  ;;  %3580 = vmatmul.mubr.msk.bf16.gmra.mxu0 %vm341_vm1, %v4579_v15  ;;  %v5570_v29 = vshll.u32 %v4171_v53, 16 }
  0x69   : > { %v886_v38 = vrot.slane %v885_v5, 4  ;;  %v4587_v0 = vcombine.low %v867_v47, %v877_v32  ;;  %v895_v50 = vor.u32 %v894_v57, %v890_v62  ;;  %v1374_v63 = vsel %vm4158_vm7, %v3186_v34, %v1373_v61  ;;  %v243_v5 = vld [vmem:[%s3942_s29 + $0xb0] sm:$0x1] }
  0x6a   : > { %v905_v40 = vrot.slane %v5569_v54, 4  ;;  %v1375_v12 = vrot.slane %v1373_v61, 4  ;;  %v908_v45 = vrot.slane %v5570_v29, 5  ;;  %v912_v48 = vshll.u32 %v4174_v36, 16 }
  0x6b   : > { %v891_v7 = vsel %vm4131_vm6, %v886_v38, %v890_v62  ;;  %v5571_v16 = vshrl.u32 %v4174_v36, 16  ;;  %3546 = vmatmul.mubr.msk.bf16.gmra.mxu1 %vm341_vm1, %v4587_v0  ;;  %v896_v17 = vrot.slane %v895_v50, 4  ;;  %v922_v10 = vshll.u32 %v240_v9, 16 }
  0x6c   : > { %v1377_v2 = vsel %vm4158_vm7, %v1375_v12, %v1376_v37  ;;  %v3187_v51 = vrot.slane %v4171_v53, 9  ;;  %v909_v39 = vor.u32 %v908_v45, %v905_v40  ;;  %v914_v52 = vrot.slane %v912_v48, 5 }
  0x6d   : > { %v918_v18 = vrot.slane %v5571_v16, 4  ;;  %v4605_v47 = vcombine.low %v1374_v63, %v1377_v2  ;;  %v1380_v57 = vrot.slane %v4174_v36, 5  ;;  %v901_v21 = vsel %vm4131_vm6, %v896_v17, %v900_v22 }
  0x6e   : > { %v924_v4 = vrot.slane %v922_v10, 5  ;;  %v1383_v24 = vrot.slane %v240_v9, 5  ;;  %v5572_v34 = vshrl.u32 %v4198_v23, 16  ;;  %v4613_v61 = vcombine.low %v891_v7, %v901_v21 }
  0x6f   : > { %3583 = vmatprep.mubr.msk.bf16.mxu0 %vm341_vm1, %v4605_v47  ;;  %v910_v53 = vrot.slane %v909_v39, 4  ;;  %v919_v32 = vor.u32 %v918_v18, %v914_v52  ;;  %v1381_v38 = vsel %vm4158_vm7, %v3187_v51, %v1380_v57  ;;  %v1382_v36 = vrot.slane %v1380_v57, 4  ;;  %v246_v51 = vld [vmem:[%s3942_s29 + $0xbc] sm:$0x1] }
  0x70   : > { %v929_v62 = vrot.slane %v5572_v34, 4  ;;  %v5573_v37 = vshll.u32 %v4198_v23, 16  ;;  %v936_v9 = vshll.u32 %v4218_v11, 16  ;;  %v5574_v54 = vshrl.u32 %v4218_v11, 16  ;;  %3549 = vmatprep.mubr.msk.bf16.mxu1 %vm341_vm1, %v4613_v61 }
  0x71   : > { %v915_v50 = vsel %vm4131_vm6, %v910_v53, %v914_v52  ;;  %v920_v63 = vrot.slane %v919_v32, 4  ;;  %v946_v12 = vshll.u32 %v243_v5, 16  ;;  %v3188_v7 = vrot.slane %v4198_v23, 9 }
  0x72   : > { %v932_v22 = vrot.slane %v5573_v37, 5  ;;  %v942_v40 = vrot.slane %v5574_v54, 4  ;;  %v1384_v29 = vsel %vm4158_vm7, %v1382_v36, %v1383_v24  ;;  %v938_v48 = vrot.slane %v936_v9, 5 }
  0x73   : > { %v1387_v16 = vrot.slane %v4218_v11, 5  ;;  %v925_v18 = vsel %vm4131_vm6, %v920_v63, %v924_v4  ;;  %v4634_v17 = vcombine.low %v1381_v38, %v1384_v29  ;;  %v948_v2 = vrot.slane %v946_v12, 5 }
  0x74   : > { %v933_v45 = vor.u32 %v932_v22, %v929_v62  ;;  %v1390_v10 = vrot.slane %v243_v5, 5  ;;  %v4637_v39 = vcombine.low %v915_v50, %v925_v18  ;;  %v943_v57 = vor.u32 %v942_v40, %v938_v48  ;;  %v5577_v62 = vld [vmem:[#allocation17_spill] sm:$0xff] }
  0x75   : > { %v1388_v23 = vsel %vm4158_vm7, %v3188_v7, %v1387_v16  ;;  %3584 = vmatmul.mubr.msk.bf16.gmra.mxu0 %vm341_vm1, %v4634_v17  ;;  %v1389_v21 = vrot.slane %v1387_v16, 4  ;;  %v5575_v11 = vshrl.u32 %v4249_v27, 16  ;;  %v5576_v4 = vshll.u32 %v4249_v27, 16 }
  0x76   : > { %v934_v52 = vrot.slane %v933_v45, 4  ;;  %v960_v5 = vshll.u32 %v5577_v62, 16  ;;  %3550 = vmatmul.mubr.msk.bf16.gmra.mxu1 %vm341_vm1, %v4637_v39  ;;  %v944_v32 = vrot.slane %v943_v57, 4  ;;  %v5578_v38 = vshrl.u32 %v5577_v62, 16 }
  0x77   : > { %v953_v24 = vrot.slane %v5575_v11, 4  ;;  %v956_v34 = vrot.slane %v5576_v4, 5  ;;  %v970_v37 = vshll.u32 %v246_v51, 16  ;;  %v1391_v22 = vsel %vm4158_vm7, %v1389_v21, %v1390_v10  ;;  %v4681_v21 = vld [vmem:[%s3942_s29 + $0xc0] sm:$0xf] }
  0x78   : > { %v939_v53 = vsel %vm4131_vm6, %v934_v52, %v938_v48  ;;  %v966_v36 = vrot.slane %v5578_v38, 4  ;;  %v962_v54 = vrot.slane %v960_v5, 5  ;;  %v3189_v40 = vrot.slane %v4249_v27, 9  ;;  %v4684_v11 = vld [vmem:[%s3942_s29 + $0xc4] sm:$0xf]  ;;  %v5582_v5 = vld [vmem:[#allocation3_spill] sm:$0xff] }
  0x79   : > { %v957_v9 = vor.u32 %v956_v34, %v953_v24  ;;  %v949_v50 = vsel %vm4131_vm6, %v944_v32, %v948_v2  ;;  %v4659_v63 = vcombine.low %v1388_v23, %v1391_v22  ;;  %v972_v12 = vrot.slane %v970_v37, 5  ;;  %v249_v24 = vld [vmem:[%s3942_s29 + $0xc8] sm:$0x1] }
  0x7a   : > { %v1394_v7 = vrot.slane %v5577_v62, 5  ;;  %v4662_v29 = vcombine.low %v939_v53, %v949_v50  ;;  %v967_v48 = vor.u32 %v966_v36, %v962_v54  ;;  %v1397_v16 = vrot.slane %v246_v51, 5  ;;  %v5588_v50 = vld [vmem:[#allocation15_spill] sm:$0xff] }
  0x7b   : > { %v958_v45 = vrot.slane %v957_v9, 4  ;;  %3587 = vmatprep.mubr.msk.bf16.mxu0 %vm341_vm1, %v4659_v63  ;;  %v3259_v4 = vrot.slane %v4681_v21, 9  ;;  %v2130_v34 = vrot.slane %v4684_v11, 5  ;;  %v2133_v62 = vrot.slane %v249_v24, 5  ;;  %v5584_v9 = vld [vmem:[#allocation5_spill] sm:$0xff] }
  0x7c   : > { %5579 = vst [vmem:[#allocation17_spill] sm:$0xff] %v4662_v29  ;;  %v1395_v27 = vsel %vm4158_vm7, %v3189_v40, %v1394_v7  ;;  %v1396_v18 = vrot.slane %v1394_v7, 4  ;;  %3553 = vmatprep.mubr.msk.bf16.mxu1 %vm341_vm1, %v4662_v29  ;;  %v968_v10 = vrot.slane %v967_v48, 4  ;;  %v2350_v37 = vsel %vm390_vm0, %v4346_v46, 0  ;;  %v5585_v46 = vld [vmem:[#allocation7_spill] sm:$0xff]  ;;  %v5587_v40 = vld [vmem:[#allocation13_spill] sm:$0xff] }
  0x7d   : > { %v963_v2 = vsel %vm4131_vm6, %v958_v45, %v962_v54  ;;  %v2131_v53 = vsel %vm4158_vm7, %v3259_v4, %v2130_v34  ;;  %v2132_v32 = vrot.slane %v2130_v34, 4  ;;  %v2144_v22 = vsel %vm390_vm0, %v4357_v56, 0  ;;  %v3315_v54 = vld [vmem:[%s5476_s1 + $0x10] sm:$0x3]  ;;  %v5586_v56 = vld [vmem:[#allocation9_spill] sm:$0xff]  ;;  %v5591_v45 = vld [vmem:[#allocation6_spill] sm:$0xff] }
  0x7e   : > { %v1398_v52 = vsel %vm4158_vm7, %v1396_v18, %v1397_v16  ;;  %v973_v51 = vsel %vm4131_vm6, %v968_v10, %v972_v12  ;;  %v5589_v12 = vld [vmem:[#allocation2_spill] sm:$0xff]  ;;  %v5590_v7 = vld [vmem:[#allocation4_spill] sm:$0xff]  ;;  %v1900_v48 = vshrl.u32 %v4681_v21, 16  ;;  %v1903_v16 = vshll.u32 %v4681_v21, 16  ;;  %v5593_v34 = vld [vmem:[#allocation11_spill] sm:$0xff] }
  0x7f   : > { %v4676_v57 = vcombine.low %v1395_v27, %v1398_v52  ;;  %v4678_v23 = vcombine.low %v963_v2, %v973_v51  ;;  %v2134_v38 = vsel %vm4158_vm7, %v2132_v32, %v2133_v62  ;;  %v1913_v27 = vshrl.u32 %v4684_v11, 16  ;;  %v5592_v2 = vld [vmem:[#allocation8_spill] sm:$0xff]  ;;  %v5594_v32 = vld [vmem:[#allocation14_spill] sm:$0xff] }
  0x80   : > { %v4701_v36 = vcombine.low %v2131_v53, %v2134_v38  ;;  %v1909_v18 = vshll.u32 %v4684_v11, 16  ;;  %v1902_v10 = vrot.slane %v1900_v48, 4  ;;  %v1905_v52 = vrot.slane %v1903_v16, 5  ;;  %v5595_v48 = vld [vmem:[#allocation16_spill] sm:$0xff] }
  0x81   : > { %5580 = vst [vmem:[#allocation18_spill] sm:$0xff] %v4676_v57  ;;  %5581 = vst [vmem:[#allocation19_spill] sm:$0xff] %v4678_v23  ;;  %3588 = vmatmul.mubr.msk.bf16.gmra.mxu0 %vm341_vm1, %v4676_v57  ;;  %3554 = vmatmul.mubr.msk.bf16.gmra.mxu1 %vm341_vm1, %v4678_v23  ;;  %v1915_v4 = vrot.slane %v1913_v27, 4  ;;  %v1919_v53 = vshll.u32 %v249_v24, 16 }
  0x82   : > { %3627 = vmatprep.mubr.msk.bf16.mxu0 %vm341_vm1, %v4297_v14  ;;  %3593 = vmatprep.mubr.msk.bf16.mxu1 %vm341_vm1, %v5582_v5  ;;  %5583 = vst [vmem:[#allocation3_spill] sm:$0xff] %v4701_v36  ;;  %v3296_v14 = vld [vmem:[%s5476_s1 + $0xe] sm:$0x3]  ;;  %v1911_v51 = vrot.slane %v1909_v18, 5  ;;  %v1906_v62 = vor.u32 %v1905_v52, %v1902_v10  ;;  %v3224_v18 = vcombine.low %v4681_v21, %v4684_v11  ;;  %v2790_v10 = vsel %vm390_vm0, %v3315_v54, 0 }
  0x83   : > { %v2578_v52 = vsel %vm390_vm0, %v3296_v14, 0 }
  0x84   : > { %v1916_v5 = vor.u32 %v1915_v4, %v1911_v51  ;;  %v1907_v38 = vrot.slane %v1906_v62, 4 }
  0x86   : > { %v1912_v16 = vsel %vm4131_vm6, %v1907_v38, %v1911_v51 }
  0x89   : > { %3628 = vmatmul.mubr.msk.bf16.vlgmr.msra.gmra.mxu0 %vm341_vm1, %v4324_v49  ;;  %3594 = vmatmul.mubr.msk.bf16.vlgmr.msra.gmra.mxu1 %vm341_vm1, %v5584_v9 }
  0x8a   : > { %3694 = vmatpush3.bf16.msra.mxu0 %v2350_v37  ;;  %3660 = vmatpush3.bf16.msra.mxu1 %v2144_v22  ;;  %v1917_v37 = vrot.slane %v1916_v5, 4  ;;  %v1921_v22 = vrot.slane %v1919_v53, 5 }
  0x8b   : > { %3597 = vmatprep.mubr.msk.bf16.mxu1 %vm341_vm1, %v5585_v46  ;;  %3631 = vmatprep.mubr.msk.bf16.mxu0 %vm341_vm1, %v4362_v26 }
  0x8c   : > { %3805 = vmatprep.subr.msk.bf16.mxu1 %vm390_vm0, %v3296_v14  ;;  %3806 = vmatprep.subr.msk.bf16.mxu0 %vm390_vm0, %v3315_v54  ;;  %v1922_v24 = vsel %vm4131_vm6, %v1917_v37, %v1921_v22 }
  0x8d   : > { %v4779_v27 = vcombine.low %v1912_v16, %v1922_v24  ;;  %v4889_v16 = vld [vmem:[%s3942_s29 + $0xd0] sm:$0xf] }
  0x8f   : > { %5596 = vst [vmem:[#allocation5_spill] sm:$0xff] %v4779_v27 }
  0x91   : > { %3632 = vmatmul.mubr.msk.bf16.gmra.mxu0 %vm341_vm1, %v4395_v1  ;;  %3598 = vmatmul.mubr.msk.bf16.gmra.mxu1 %vm341_vm1, %v5586_v56 }
  0x92   : > { %3635 = vmatprep.mubr.msk.bf16.mxu0 %vm341_vm1, %v4425_v33  ;;  %3601 = vmatprep.mubr.msk.bf16.mxu1 %vm341_vm1, %v5587_v40 }
  0x99   : > { %3636 = vmatmul.mubr.msk.bf16.gmra.mxu0 %vm341_vm1, %v4454_v28  ;;  %3602 = vmatmul.mubr.msk.bf16.gmra.mxu1 %vm341_vm1, %v5588_v50 }
  0x9a   : > { %3639 = vmatprep.mubr.msk.bf16.mxu0 %vm341_vm1, %v4492_v30  ;;  %3605 = vmatprep.mubr.msk.bf16.mxu1 %vm341_vm1, %v4243_v43 }
  0xa1   : > { %3640 = vmatmul.mubr.msk.bf16.gmra.mxu0 %vm341_vm1, %v4500_v59  ;;  %3606 = vmatmul.mubr.msk.bf16.gmra.mxu1 %vm341_vm1, %v5589_v12 }
  0xa2   : > { %3643 = vmatprep.mubr.msk.bf16.mxu0 %vm341_vm1, %v4533_v25  ;;  %3609 = vmatprep.mubr.msk.bf16.mxu1 %vm341_vm1, %v5590_v7 }
  0xa9   : > { %3644 = vmatmul.mubr.msk.bf16.gmra.mxu0 %vm341_vm1, %v4559_v19  ;;  %3610 = vmatmul.mubr.msk.bf16.gmra.mxu1 %vm341_vm1, %v5591_v45 }
  0xaa   : > { %3647 = vmatprep.mubr.msk.bf16.mxu0 %vm341_vm1, %v4587_v0  ;;  %3613 = vmatprep.mubr.msk.bf16.mxu1 %vm341_vm1, %v5592_v2 }
  0xb1   : > { %3648 = vmatmul.mubr.msk.bf16.gmra.mxu0 %vm341_vm1, %v4613_v61  ;;  %3614 = vmatmul.mubr.msk.bf16.gmra.mxu1 %vm341_vm1, %v5593_v34 }
  0xb2   : > { %3651 = vmatprep.mubr.msk.bf16.mxu0 %vm341_vm1, %v4637_v39  ;;  %3617 = vmatprep.mubr.msk.bf16.mxu1 %vm341_vm1, %v5594_v32 }
  0xb9   : > { %3652 = vmatmul.mubr.msk.bf16.gmra.mxu0 %vm341_vm1, %v4662_v29  ;;  %3618 = vmatmul.mubr.msk.bf16.gmra.mxu1 %vm341_vm1, %v5595_v48 }
  0xba   : > { %3655 = vmatprep.mubr.msk.bf16.mxu0 %vm341_vm1, %v4678_v23  ;;  %3621 = vmatprep.mubr.msk.bf16.mxu1 %vm341_vm1, %v4267_v31 }
  0xc1   : > { %3656 = vmatmul.mubr.msk.bf16.gmra.mxu0 %vm341_vm1, %v4779_v27  ;;  %3622 = vmatmul.mubr.msk.bf16.gmra.mxu1 %vm341_vm1, %v3224_v18 }
  0xc2   : > { %3695 = vmatprep.mubr.msk.bf16.mxu0 %vm341_vm1, %v5584_v9  ;;  %3661 = vmatprep.mubr.msk.bf16.mxu1 %vm341_vm1, %v4291_v20 }
  0xc9   : > { %3696 = vmatmul.mubr.msk.bf16.vlgmr.msra.gmra.mxu0 %vm341_vm1, %v5585_v46  ;;  %3662 = vmatmul.mubr.msk.bf16.vlgmr.msra.gmra.mxu1 %vm341_vm1, %v4326_v55 }
  0xca   : > { %3762 = vmatpush3.bf16.msra.mxu0 %v2790_v10  ;;  %3728 = vmatpush3.bf16.msra.mxu1 %v2578_v52 }
  0xcb   : > { %3665 = vmatprep.mubr.msk.bf16.mxu1 %vm341_vm1, %v4352_v60  ;;  %3699 = vmatprep.mubr.msk.bf16.mxu0 %vm341_vm1, %v5586_v56 }
  0xd1   : > { %3700 = vmatmul.mubr.msk.bf16.gmra.mxu0 %vm341_vm1, %v5587_v40  ;;  %3666 = vmatmul.mubr.msk.bf16.gmra.mxu1 %vm341_vm1, %v4392_v58 }
  0xd2   : > { %3703 = vmatprep.mubr.msk.bf16.mxu0 %vm341_vm1, %v5588_v50  ;;  %3669 = vmatprep.mubr.msk.bf16.mxu1 %vm341_vm1, %v4422_v8 }
  0xd9   : > { %3704 = vmatmul.mubr.msk.bf16.gmra.mxu0 %vm341_vm1, %v4243_v43  ;;  %3670 = vmatmul.mubr.msk.bf16.gmra.mxu1 %vm341_vm1, %v4443_v3  ;;  %v3493_v20 = vpop.f32.mrf.mxu0 }
  0xda   : > { %3707 = vmatprep.mubr.msk.bf16.mxu0 %vm341_vm1, %v5589_v12  ;;  %3673 = vmatprep.mubr.msk.bf16.mxu1 %vm341_vm1, %v4481_v44 }
  0xdb   : > { %v4824_v43 = vpop.f32.mrf.mxu1  ;;  %v428_v21 = vpop.f32.mrf.mxu0 }
  0xdd   : > { %v4826_v11 = vpop.f32.mrf.mxu1  ;;  %v3494_v14 = vpop.f32.mrf.mxu0 }
  0xdf   : > { %v4828_v9 = vpop.f32.mrf.mxu1  ;;  %v431_v54 = vpop.f32.mrf.mxu0 }
  0xe1   : > { %3708 = vmatmul.mubr.msk.bf16.gmra.mxu0 %vm341_vm1, %v5590_v7  ;;  %3674 = vmatmul.mubr.msk.bf16.gmra.mxu1 %vm341_vm1, %v4502_v6  ;;  %v4834_v46 = vpop.f32.mrf.mxu1  ;;  %v3497_v56 = vpop.f32.mrf.mxu0 }
  0xe2   : > { %3711 = vmatprep.mubr.msk.bf16.mxu0 %vm341_vm1, %v5591_v45  ;;  %3677 = vmatprep.mubr.msk.bf16.mxu1 %vm341_vm1, %v4530_v42 }
  0xe3   : > { %v4840_v40 = vpop.f32.mrf.mxu1  ;;  %v4842_v50 = vpop.f32.mrf.mxu0 }
  0xe5   : > { %v4844_v12 = vpop.f32.mrf.mxu1  ;;  %v4846_v7 = vpop.f32.mrf.mxu0 }
  0xe7   : > { %v4848_v45 = vpop.f32.mrf.mxu1 }
  0xe9   : > { %3712 = vmatmul.mubr.msk.bf16.gmra.mxu0 %vm341_vm1, %v5592_v2  ;;  %3678 = vmatmul.mubr.msk.bf16.gmra.mxu1 %vm341_vm1, %v4556_v35  ;;  %v4850_v2 = vpop.f32.mrf.mxu0  ;;  %v4856_v51 = vpop.f32.mrf.mxu1 }
  0xea   : > { %3715 = vmatprep.mubr.msk.bf16.mxu0 %vm341_vm1, %v5593_v34  ;;  %3681 = vmatprep.mubr.msk.bf16.mxu1 %vm341_vm1, %v4579_v15  ;;  %5597 = vst [vmem:[#allocation7_spill] sm:$0xff] %v4856_v51 }
  0xeb   : > { %v4860_v4 = vpop.f32.mrf.mxu0  ;;  %v4864_v34 = vpop.f32.mrf.mxu1 }
  0xec   : > { %5598 = vst [vmem:[#allocation9_spill] sm:$0xff] %v4864_v34 }
  0xed   : > { %v4866_v62 = vpop.f32.mrf.mxu0  ;;  %v4868_v5 = vpop.f32.mrf.mxu1 }
  0xee   : > { %5599 = vst [vmem:[#allocation13_spill] sm:$0xff] %v4868_v5 }
  0xef   : > { %v4870_v53 = vpop.f32.mrf.mxu0 }
  0xf1   : > { %3716 = vmatmul.mubr.msk.bf16.gmra.mxu0 %vm341_vm1, %v5594_v32  ;;  %3682 = vmatmul.mubr.msk.bf16.gmra.mxu1 %vm341_vm1, %v4605_v47  ;;  %v4872_v32 = vpop.f32.mrf.mxu1  ;;  %v4874_v38 = vpop.f32.mrf.mxu0 }
  0xf2   : > { %3719 = vmatprep.mubr.msk.bf16.mxu0 %vm341_vm1, %v5595_v48  ;;  %3685 = vmatprep.mubr.msk.bf16.mxu1 %vm341_vm1, %v4634_v17  ;;  %5600 = vst [vmem:[#allocation15_spill] sm:$0xff] %v4872_v32  ;;  %v4886_v48 = vld [vmem:[%s3942_s29 + $0xcc] sm:$0xf]  ;;  %v4911_v32 = vld [vmem:[%s5477_s2] ss:$0 sm:$0xff] }
  0xf3   : > { %v4880_v37 = vpop.f32.mrf.mxu1  ;;  %v4883_v22 = vpop.f32.mrf.mxu0  ;;  %v555_v13 = vadd.f32 %v4911_v32, %v428_v21  ;;  %v556_v51 = vadd.f32 %v4911_v32, %v431_v54 }
  0xf4   : > { %5601 = vst [vmem:[#allocation2_spill] sm:$0xff] %v4880_v37 }
  0xf5   : > { %v4893_v24 = vpop.f32.mrf.mxu1  ;;  %v4895_v10 = vpop.f32.mrf.mxu0 }
  0xf6   : > { %5602 = vst [vmem:[#allocation4_spill] sm:$0xff] %v4893_v24 }
  0xf7   : > { %v4899_v52 = vpop.f32.mrf.mxu1  ;;  %v4901_v37 = vpop.f32.mrf.mxu0 }
  0xf8   : > { %5603 = vst [vmem:[#allocation6_spill] sm:$0xff] %v4899_v52 }
  0xf9   : > { %3720 = vmatmul.mubr.msk.bf16.gmra.mxu0 %vm341_vm1, %v4267_v31  ;;  %3686 = vmatmul.mubr.msk.bf16.gmra.mxu1 %vm341_vm1, %v4659_v63  ;;  %v3279_v31 = vcombine.low %v4886_v48, %v4889_v16  ;;  %v4905_v27 = vpop.f32.mrf.mxu0 }
  0xfa   : > { %3723 = vmatprep.mubr.msk.bf16.mxu0 %vm341_vm1, %v3224_v18  ;;  %3689 = vmatprep.mubr.msk.bf16.mxu1 %vm341_vm1, %v4676_v57  ;;  %v4903_v18 = vpop.f32.mrf.mxu1 }
  0xfb   : > { %5604 = vst [vmem:[#allocation8_spill] sm:$0xff] %v4903_v18  ;;  %v3561_v52 = vpop.f32.mrf.mxu0  ;;  %v557_v18 = vadd.f32 %v3493_v20, %v4911_v32 }
  0xfc   : > { %v4915_v24 = vpop.f32.mrf.mxu1 }
  0xfd   : > { %5605 = vst [vmem:[#allocation11_spill] sm:$0xff] %v4915_v24  ;;  %v1534_v41 = vpop.f32.mrf.mxu0 }
  0xff   : > { %v3562_v5 = vpop.f32.mrf.mxu0 }
 0x101   : > { %3724 = vmatmul.mubr.msk.bf16.gmra.mxu0 %vm341_vm1, %v3279_v31  ;;  %3690 = vmatmul.mubr.msk.bf16.gmra.mxu1 %vm341_vm1, %v4701_v36  ;;  %v3527_v31 = vpop.f32.mrf.mxu1  ;;  %v558_v36 = vadd.f32 %v3494_v14, %v4911_v32 }
 0x102   : > { %3763 = vmatprep.mubr.msk.bf16.mxu0 %vm341_vm1, %v4326_v55  ;;  %3729 = vmatprep.mubr.msk.bf16.mxu1 %vm341_vm1, %v4324_v49  ;;  %v1238_v23 = vadd.f32 %v3527_v31, %v557_v18  ;;  %v1537_v55 = vpop.f32.mrf.mxu0 }
 0x103   : > { %v1109_v57 = vpop.f32.mrf.mxu1 }
 0x104   : > { %v4924_v34 = vadd.f32 %v3561_v52, %v1238_v23  ;;  %v1236_v24 = vadd.f32 %v1109_v57, %v555_v13  ;;  %v3565_v23 = vpop.f32.mrf.mxu0  ;;  %v561_v13 = vadd.f32 %v3497_v56, %v4911_v32 }
 0x105   : > { %v3528_v29 = vpop.f32.mrf.mxu1 }
 0x106   : > { %v4929_v49 = vadd.f32 %v1534_v41, %v1236_v24  ;;  %v1239_v20 = vadd.f32 %v3528_v29, %v558_v36  ;;  %v1550_v41 = vpop.f32.mrf.mxu0  ;;  %v559_v29 = vadd.f32 %v4911_v32, %v4842_v50 }
 0x107   : > { %v1112_v21 = vpop.f32.mrf.mxu1 }
 0x108   : > { %v4936_v57 = vadd.f32 %v3562_v5, %v1239_v20  ;;  %v1237_v14 = vadd.f32 %v1112_v21, %v556_v51  ;;  %v3566_v24 = vpop.f32.mrf.mxu0 }
 0x109   : > { %3764 = vmatmul.mubr.msk.bf16.vlgmr.msra.gmra.mxu0 %vm341_vm1, %v4352_v60  ;;  %3730 = vmatmul.mubr.msk.bf16.vlgmr.msra.gmra.mxu1 %vm341_vm1, %v4362_v26  ;;  %v3531_v60 = vpop.f32.mrf.mxu1 }
 0x10a   : > { %3767 = vmatprep.mubr.msk.bf16.mxu0 %vm341_vm1, %v4392_v58  ;;  %3733 = vmatprep.mubr.msk.bf16.mxu1 %vm341_vm1, %v4395_v1  ;;  %v4942_v36 = vadd.f32 %v1537_v55, %v1237_v14  ;;  %v1242_v26 = vadd.f32 %v3531_v60, %v561_v13  ;;  %v562_v58 = vadd.f32 %v4846_v7, %v4911_v32  ;;  %v1553_v52 = vpop.f32.mrf.mxu0 }
 0x10b   : > { %v1125_v54 = vpop.f32.mrf.mxu1  ;;  %v560_v1 = vadd.f32 %v4911_v32, %v4850_v2  ;;  %v565_v55 = vadd.f32 %v4860_v4, %v4911_v32  ;;  %v566_v60 = vadd.f32 %v4870_v53, %v4911_v32 }
 0x10c   : > { %v4946_v56 = vadd.f32 %v3565_v23, %v1242_v26  ;;  %v1240_v5 = vadd.f32 %v1125_v54, %v559_v29  ;;  %v3569_v7 = vpop.f32.mrf.mxu0  ;;  %v563_v23 = vadd.f32 %v4911_v32, %v4866_v62 }
 0x10d   : > { %v3532_v51 = vpop.f32.mrf.mxu1 }
 0x10e   : > { %v4952_v50 = vadd.f32 %v1550_v41, %v1240_v5  ;;  %v1243_v18 = vadd.f32 %v3532_v51, %v562_v58  ;;  %v1566_v21 = vpop.f32.mrf.mxu0  ;;  %v569_v58 = vadd.f32 %v4883_v22, %v4911_v32 }
 0x10f   : > { %v1128_v31 = vpop.f32.mrf.mxu1 }
 0x110   : > { %v4960_v20 = vadd.f32 %v3566_v24, %v1243_v18  ;;  %v1241_v2 = vadd.f32 %v1128_v31, %v560_v1  ;;  %v570_v31 = vadd.f32 %v4901_v37, %v4911_v32 }
 0x111   : > { %3768 = vmatmul.mubr.msk.bf16.gmra.mxu0 %vm341_vm1, %v4422_v8  ;;  %3734 = vmatmul.mubr.msk.bf16.gmra.mxu1 %vm341_vm1, %v4425_v33  ;;  %v3535_v8 = vpop.f32.mrf.mxu1 }
 0x112   : > { %3771 = vmatprep.mubr.msk.bf16.mxu0 %vm341_vm1, %v4443_v3  ;;  %3737 = vmatprep.mubr.msk.bf16.mxu1 %vm341_vm1, %v4454_v28  ;;  %v4966_v33 = vadd.f32 %v1553_v52, %v1241_v2  ;;  %v1246_v13 = vadd.f32 %v3535_v8, %v565_v55  ;;  %v3570_v3 = vpop.f32.mrf.mxu0  ;;  %v564_v28 = vadd.f32 %v4911_v32, %v4874_v38 }
 0x113   : > { %v1141_v14 = vpop.f32.mrf.mxu1  ;;  %v567_v52 = vadd.f32 %v4911_v32, %v4895_v10 }
 0x114   : > { %v4970_v4 = vadd.f32 %v3569_v7, %v1246_v13  ;;  %v1244_v41 = vadd.f32 %v1141_v14, %v563_v23  ;;  %v1569_v26 = vpop.f32.mrf.mxu0  ;;  %v573_v23 = vadd.f32 %v4824_v43, %v4911_v32 }
 0x115   : > { %v3536_v29 = vpop.f32.mrf.mxu1 }
 0x116   : > { %v4976_v62 = vadd.f32 %v1566_v21, %v1244_v41  ;;  %v1247_v54 = vadd.f32 %v3536_v29, %v566_v60  ;;  %v3573_v53 = vpop.f32.mrf.mxu0  ;;  %v574_v29 = vadd.f32 %v4828_v9, %v4911_v32  ;;  %v2555_v9 = vshll.u32 %v4889_v16, 16 }
 0x117   : > { %v1144_v24 = vpop.f32.mrf.mxu1 }
 0x118   : > { %v4984_v5 = vadd.f32 %v3570_v3, %v1247_v54  ;;  %v1245_v38 = vadd.f32 %v1144_v24, %v564_v28  ;;  %v1582_v51 = vpop.f32.mrf.mxu0  ;;  %v571_v3 = vadd.f32 %v4911_v32, %v4826_v11 }
 0x119   : > { %3772 = vmatmul.mubr.msk.bf16.gmra.mxu0 %vm341_vm1, %v4481_v44  ;;  %3738 = vmatmul.mubr.msk.bf16.gmra.mxu1 %vm341_vm1, %v4492_v30  ;;  %v3539_v44 = vpop.f32.mrf.mxu1 }
 0x11a   : > { %3775 = vmatprep.mubr.msk.bf16.mxu0 %vm341_vm1, %v4502_v6  ;;  %3741 = vmatprep.mubr.msk.bf16.mxu1 %vm341_vm1, %v4500_v59  ;;  %v4990_v30 = vadd.f32 %v1569_v26, %v1245_v38  ;;  %v1250_v1 = vadd.f32 %v3539_v44, %v569_v58  ;;  %v3574_v6 = vpop.f32.mrf.mxu0  ;;  %v568_v59 = vadd.f32 %v4911_v32, %v4905_v27  ;;  %v2549_v58 = vshll.u32 %v4886_v48, 16 }
 0x11b   : > { %v1157_v18 = vpop.f32.mrf.mxu1  ;;  %v2559_v38 = vshrl.u32 %v4889_v16, 16 }
 0x11c   : > { %v4994_v22 = vadd.f32 %v3573_v53, %v1250_v1  ;;  %v1248_v7 = vadd.f32 %v1157_v18, %v567_v52  ;;  %v1585_v2 = vpop.f32.mrf.mxu0  ;;  %v2546_v53 = vshrl.u32 %v4886_v48, 16  ;;  %v577_v52 = vadd.f32 %v4840_v40, %v4911_v32 }
 0x11d   : > { %v3540_v55 = vpop.f32.mrf.mxu1 }
 0x11e   : > { %v5000_v10 = vadd.f32 %v1582_v51, %v1248_v7  ;;  %v1251_v8 = vadd.f32 %v3540_v55, %v570_v31  ;;  %v3577_v37 = vpop.f32.mrf.mxu0  ;;  %v2548_v18 = vrot.slane %v2546_v53, 4  ;;  %v2561_v31 = vrot.slane %v2559_v38, 4 }
 0x11f   : > { %v1160_v21 = vpop.f32.mrf.mxu1 }
 0x120   : > { %v5008_v13 = vadd.f32 %v3574_v6, %v1251_v8  ;;  %v1249_v27 = vadd.f32 %v1160_v21, %v568_v59  ;;  %v1598_v14 = vpop.f32.mrf.mxu0  ;;  %v2551_v6 = vrot.slane %v2549_v58, 5  ;;  %v252_v21 = vld [vmem:[%s3942_s29 + $0xd4] sm:$0x1] }
 0x121   : > { %3776 = vmatmul.mubr.msk.bf16.gmra.mxu0 %vm341_vm1, %v4530_v42  ;;  %3742 = vmatmul.mubr.msk.bf16.gmra.mxu1 %vm341_vm1, %v4533_v25  ;;  %v3543_v42 = vpop.f32.mrf.mxu1 }
 0x122   : > { %3779 = vmatprep.mubr.msk.bf16.mxu0 %vm341_vm1, %v4556_v35  ;;  %3745 = vmatprep.mubr.msk.bf16.mxu1 %vm341_vm1, %v4559_v19  ;;  %v5014_v25 = vadd.f32 %v1585_v2, %v1249_v27  ;;  %v1254_v60 = vadd.f32 %v3543_v42, %v573_v23  ;;  %v3578_v35 = vpop.f32.mrf.mxu0  ;;  %v572_v19 = vadd.f32 %v4911_v32, %v4834_v46  ;;  %v2776_v23 = vrot.slane %v4889_v16, 5 }
 0x123   : > { %v1173_v41 = vpop.f32.mrf.mxu1  ;;  %v2565_v16 = vshll.u32 %v252_v21, 16 }
 0x124   : > { %v5018_v43 = vadd.f32 %v3577_v37, %v1254_v60  ;;  %v1252_v26 = vadd.f32 %v1173_v41, %v571_v3  ;;  %v1601_v54 = vpop.f32.mrf.mxu0 }
 0x125   : > { %v3544_v28 = vpop.f32.mrf.mxu1  ;;  %v2567_v38 = vrot.slane %v2565_v16, 5 }
 0x126   : > { %v5024_v11 = vadd.f32 %v1598_v14, %v1252_v26  ;;  %v1255_v24 = vadd.f32 %v3544_v28, %v574_v29  ;;  %v5606_v14 = vld [vmem:[#allocation7_spill] sm:$0xff]  ;;  %v3314_v26 = vrot.slane %v4886_v48, 9  ;;  %v2778_v28 = vrot.slane %v2776_v23, 4 }
 0x127   : > { %v1176_v44 = vpop.f32.mrf.mxu1 }
 0x128   : > { %v5034_v46 = vadd.f32 %v3578_v35, %v1255_v24  ;;  %v3581_v51 = vpop.f32.mrf.mxu0 }
 0x129   : > { %3780 = vmatmul.mubr.msk.bf16.gmra.mxu0 %vm341_vm1, %v4579_v15  ;;  %3746 = vmatmul.mubr.msk.bf16.gmra.mxu1 %vm341_vm1, %v4587_v0  ;;  %v1253_v15 = vadd.f32 %v1176_v44, %v572_v19  ;;  %v2557_v0 = vrot.slane %v2555_v9, 5  ;;  %v5608_v19 = vld [vmem:[#allocation9_spill] sm:$0xff] }
 0x12a   : > { %3783 = vmatprep.mubr.msk.bf16.mxu0 %vm341_vm1, %v4605_v47  ;;  %3749 = vmatprep.mubr.msk.bf16.mxu1 %vm341_vm1, %v4613_v61  ;;  %v1614_v55 = vpop.f32.mrf.mxu0  ;;  %v575_v47 = vadd.f32 %v4911_v32, %v4844_v12  ;;  %v578_v61 = vadd.f32 %v4848_v45, %v4911_v32  ;;  %v2552_v12 = vor.u32 %v2551_v6, %v2548_v18  ;;  %v5610_v18 = vld [vmem:[#allocation18_spill] sm:$0xff]  ;;  %v5611_v6 = vld [vmem:[#allocation19_spill] sm:$0xff] }
 0x12b   : > { %v5040_v1 = vadd.f32 %v1601_v54, %v1253_v15  ;;  %v3547_v7 = vpop.f32.mrf.mxu1  ;;  %v2562_v42 = vor.u32 %v2561_v31, %v2557_v0  ;;  %v576_v45 = vadd.f32 %v4911_v32, %v5606_v14  ;;  %v2779_v54 = vrot.slane %v252_v21, 5  ;;  %v5609_v15 = vld [vmem:[#allocation13_spill] sm:$0xff]  ;;  %v5615_v21 = vld [vmem:[#allocation15_spill] sm:$0xff] }
 0x12c   : > { %v1258_v2 = vadd.f32 %v3547_v7, %v577_v52  ;;  %v3582_v8 = vpop.f32.mrf.mxu0  ;;  %v581_v24 = vadd.f32 %v5608_v19, %v4911_v32  ;;  %v5612_v7 = vld [vmem:[#allocation3_spill] sm:$0xff] }
 0x12d   : > { %v1189_v59 = vpop.f32.mrf.mxu1  ;;  %v2563_v9 = vrot.slane %v2562_v42, 4  ;;  %v5616_v42 = vld [vmem:[#allocation5_spill] sm:$0xff] }
 0x12e   : > { %v5047_v37 = vadd.f32 %v3581_v51, %v1258_v2  ;;  %v1256_v40 = vadd.f32 %v1189_v59, %v575_v47  ;;  %v1617_v41 = vpop.f32.mrf.mxu0  ;;  %v579_v51 = vadd.f32 %v4911_v32, %v5609_v15  ;;  %v2777_v59 = vsel %vm4158_vm7, %v3314_v26, %v2776_v23 }
 0x12f   : > { %v3548_v27 = vpop.f32.mrf.mxu1  ;;  %v2568_v14 = vsel %vm4131_vm6, %v2563_v9, %v2567_v38  ;;  %v5619_v9 = vld [vmem:[#allocation6_spill] sm:$0xff] }
 0x130   : > { %v5058_v3 = vadd.f32 %v1614_v55, %v1256_v40  ;;  %v1259_v60 = vadd.f32 %v3548_v27, %v578_v61  ;;  %v582_v61 = vadd.f32 %v5615_v21, %v4911_v32  ;;  %v583_v38 = vadd.f32 %v4911_v32, %v5619_v9  ;;  %v5621_v55 = vld [vmem:[#allocation11_spill] sm:$0xff] }
 0x131   : > { %3784 = vmatmul.mubr.msk.bf16.gmra.mxu0 %vm341_vm1, %v4634_v17  ;;  %3750 = vmatmul.mubr.msk.bf16.gmra.mxu1 %vm341_vm1, %v4637_v39  ;;  %v5607_v17 = vld [vmem:[#allocation17_spill] sm:$0xff]  ;;  %v1192_v35 = vpop.f32.mrf.mxu1 }
 0x132   : > { %3787 = vmatprep.mubr.msk.bf16.mxu0 %vm341_vm1, %v4659_v63  ;;  %3753 = vmatprep.mubr.msk.bf16.mxu1 %vm341_vm1, %v5607_v17  ;;  %v5062_v29 = vadd.f32 %v3582_v8, %v1259_v60  ;;  %v1257_v39 = vadd.f32 %v1192_v35, %v576_v45  ;;  %v2553_v63 = vrot.slane %v2552_v12, 4  ;;  %v2780_v8 = vsel %vm4158_vm7, %v2778_v28, %v2779_v54  ;;  %v5617_v45 = vld [vmem:[#allocation2_spill] sm:$0xff]  ;;  %v5618_v28 = vld [vmem:[#allocation4_spill] sm:$0xff] }
 0x133   : > { %v580_v23 = vadd.f32 %v4911_v32, %v5617_v45  ;;  %v3316_v16 = vcombine.low %v2777_v59, %v2780_v8  ;;  %v585_v54 = vadd.f32 %v5618_v28, %v4911_v32 }
 0x134   : > { %v5067_v53 = vadd.f32 %v1617_v41, %v1257_v39  ;;  %v2558_v47 = vsel %vm4131_vm6, %v2553_v63, %v2557_v0 }
 0x135   : > { %v3585_v58 = vpop.f32.mrf.mxu0  ;;  %v3297_v39 = vcombine.low %v2558_v47, %v2568_v14  ;;  %v584_v47 = vadd.f32 %v4911_v32, %v5621_v55 }
 0x136   : > { %v3551_v44 = vpop.f32.mrf.mxu1 }
 0x137   : > { %v1262_v52 = vadd.f32 %v3551_v44, %v581_v24  ;;  %v1630_v48 = vpop.f32.mrf.mxu0 }
 0x138   : > { %v1205_v31 = vpop.f32.mrf.mxu1 }
 0x139   : > { %3788 = vmatmul.mubr.msk.bf16.gmra.mxu0 %vm341_vm1, %v5610_v18  ;;  %3754 = vmatmul.mubr.msk.bf16.gmra.mxu1 %vm341_vm1, %v5611_v6  ;;  %v5085_v40 = vadd.f32 %v3585_v58, %v1262_v52  ;;  %v1260_v27 = vadd.f32 %v1205_v31, %v579_v51  ;;  %v3586_v12 = vpop.f32.mrf.mxu0  ;;  %v5620_v52 = vld [vmem:[#allocation8_spill] sm:$0xff] }
 0x13a   : > { %3791 = vmatprep.mubr.msk.bf16.mxu0 %vm341_vm1, %v5612_v7  ;;  %3757 = vmatprep.mubr.msk.bf16.mxu1 %vm341_vm1, %v5616_v42  ;;  %v3552_v0 = vpop.f32.mrf.mxu1  ;;  %v586_v18 = vadd.f32 %v5620_v52, %v4911_v32 }
 0x13b   : > { %v5093_v60 = vadd.f32 %v1630_v48, %v1260_v27  ;;  %v1263_v41 = vadd.f32 %v3552_v0, %v582_v61  ;;  %v1633_v17 = vpop.f32.mrf.mxu0 }
 0x13c   : > { %v1208_v35 = vpop.f32.mrf.mxu1 }
 0x13d   : > { %v5095_v26 = vadd.f32 %v3586_v12, %v1263_v41  ;;  %v1261_v63 = vadd.f32 %v1208_v35, %v580_v23 }
 0x13f   : > { %v5099_v19 = vadd.f32 %v1633_v17, %v1261_v63 }
 0x141   : > { %v3589_v24 = vpop.f32.mrf.mxu0  ;;  %3792 = vmatmul.mubr.msk.bf16.gmra.mxu0 %vm341_vm1, %v3316_v16  ;;  %v3555_v58 = vpop.f32.mrf.mxu1  ;;  %3758 = vmatmul.mubr.msk.bf16.gmra.mxu1 %vm341_vm1, %v3297_v39 }
 0x142   : > { %v1266_v44 = vadd.f32 %v3555_v58, %v585_v54 }
 0x143   : > { %v1646_v15 = vpop.f32.mrf.mxu0  ;;  %v1221_v51 = vpop.f32.mrf.mxu1 }
 0x144   : > { %v5107_v48 = vadd.f32 %v3589_v24, %v1266_v44  ;;  %v1264_v6 = vadd.f32 %v1221_v51, %v583_v38 }
 0x145   : > { %v3590_v31 = vpop.f32.mrf.mxu0  ;;  %v3556_v7 = vpop.f32.mrf.mxu1 }
 0x146   : > { %v5111_v2 = vadd.f32 %v1646_v15, %v1264_v6  ;;  %v1267_v59 = vadd.f32 %v3556_v7, %v586_v18 }
 0x147   : > { %v1649_v8 = vpop.f32.mrf.mxu0  ;;  %v1224_v21 = vpop.f32.mrf.mxu1 }
 0x148   : > { %v5113_v61 = vadd.f32 %v3590_v31, %v1267_v59  ;;  %v1265_v27 = vadd.f32 %v1224_v21, %v584_v47 }
 0x149   : > { %v3629_v12 = vpop.f32.mrf.mxu0  ;;  %v3595_v42 = vpop.f32.mrf.mxu1 }
 0x14a   : > { %v5115_v14 = vadd.f32 %v1649_v8, %v1265_v27  ;;  %v1869_v0 = vadd.f32 %v3595_v42, %v4924_v34 }
 0x14b   : > { %v1968_v45 = vpop.f32.mrf.mxu0  ;;  %v1740_v23 = vpop.f32.mrf.mxu1 }
 0x14c   : > { %v5118_v41 = vadd.f32 %v3629_v12, %v1869_v0  ;;  %v1867_v32 = vadd.f32 %v1740_v23, %v4929_v49 }
 0x14d   : > { %v3630_v17 = vpop.f32.mrf.mxu0  ;;  %v3596_v16 = vpop.f32.mrf.mxu1 }
 0x14e   : > { %v5121_v35 = vadd.f32 %v1968_v45, %v1867_v32  ;;  %v1870_v39 = vadd.f32 %v3596_v16, %v4936_v57 }
 0x14f   : > { %v1971_v63 = vpop.f32.mrf.mxu0  ;;  %v1743_v28 = vpop.f32.mrf.mxu1 }
 0x150   : > { %v5124_v54 = vadd.f32 %v3630_v17, %v1870_v39  ;;  %v1868_v24 = vadd.f32 %v1743_v28, %v4942_v36 }
 0x151   : > { %v3633_v58 = vpop.f32.mrf.mxu0  ;;  %v3599_v34 = vpop.f32.mrf.mxu1 }
 0x152   : > { %v5127_v9 = vadd.f32 %v1971_v63, %v1868_v24  ;;  %v1873_v38 = vadd.f32 %v3599_v34, %v4946_v56 }
 0x153   : > { %v1984_v44 = vpop.f32.mrf.mxu0  ;;  %v1756_v49 = vpop.f32.mrf.mxu1 }
 0x154   : > { %v5130_v15 = vadd.f32 %v3633_v58, %v1873_v38  ;;  %v1871_v51 = vadd.f32 %v1756_v49, %v4952_v50 }
 0x155   : > { %v3634_v52 = vpop.f32.mrf.mxu0  ;;  %v3600_v57 = vpop.f32.mrf.mxu1 }
 0x156   : > { %v5133_v18 = vadd.f32 %v1984_v44, %v1871_v51  ;;  %v1874_v6 = vadd.f32 %v3600_v57, %v4960_v20 }
 0x157   : > { %v1987_v31 = vpop.f32.mrf.mxu0  ;;  %v1759_v36 = vpop.f32.mrf.mxu1 }
 0x158   : > { %v5136_v7 = vadd.f32 %v3634_v52, %v1874_v6  ;;  %v1872_v55 = vadd.f32 %v1759_v36, %v4966_v33 }
 0x159   : > { %v3637_v47 = vpop.f32.mrf.mxu0  ;;  %v3603_v56 = vpop.f32.mrf.mxu1 }
 0x15a   : > { %v5139_v59 = vadd.f32 %v1987_v31, %v1872_v55  ;;  %v1877_v8 = vadd.f32 %v3603_v56, %v4970_v4 }
 0x15b   : > { %v2000_v21 = vpop.f32.mrf.mxu0  ;;  %v1772_v50 = vpop.f32.mrf.mxu1 }
 0x15c   : > { %v5142_v27 = vadd.f32 %v3637_v47, %v1877_v8  ;;  %v1875_v12 = vadd.f32 %v1772_v50, %v4976_v62 }
 0x15d   : > { %v3638_v42 = vpop.f32.mrf.mxu0  ;;  %v3604_v20 = vpop.f32.mrf.mxu1 }
 0x15e   : > { %v5145_v0 = vadd.f32 %v2000_v21, %v1875_v12  ;;  %v1878_v45 = vadd.f32 %v3604_v20, %v4984_v5 }
 0x15f   : > { %v2003_v23 = vpop.f32.mrf.mxu0  ;;  %v1775_v33 = vpop.f32.mrf.mxu1 }
 0x160   : > { %v5148_v32 = vadd.f32 %v3638_v42, %v1878_v45  ;;  %v1876_v17 = vadd.f32 %v1775_v33, %v4990_v30 }
 0x161   : > { %v3641_v16 = vpop.f32.mrf.mxu0  ;;  %v3607_v4 = vpop.f32.mrf.mxu1 }
 0x162   : > { %v5151_v39 = vadd.f32 %v2003_v23, %v1876_v17  ;;  %v1881_v63 = vadd.f32 %v3607_v4, %v4994_v22 }
 0x163   : > { %v2016_v28 = vpop.f32.mrf.mxu0  ;;  %v1788_v62 = vpop.f32.mrf.mxu1 }
 0x164   : > { %v5154_v24 = vadd.f32 %v3641_v16, %v1881_v63  ;;  %v1879_v58 = vadd.f32 %v1788_v62, %v5000_v10 }
 0x165   : > { %v3642_v34 = vpop.f32.mrf.mxu0  ;;  %v3608_v5 = vpop.f32.mrf.mxu1 }
 0x166   : > { %v5157_v38 = vadd.f32 %v2016_v28, %v1879_v58  ;;  %v1882_v44 = vadd.f32 %v3608_v5, %v5008_v13 }
 0x167   : > { %v2019_v49 = vpop.f32.mrf.mxu0  ;;  %v1791_v30 = vpop.f32.mrf.mxu1 }
 0x168   : > { %v5160_v51 = vadd.f32 %v3642_v34, %v1882_v44  ;;  %v1880_v52 = vadd.f32 %v1791_v30, %v5014_v25 }
 0x169   : > { %v3645_v57 = vpop.f32.mrf.mxu0  ;;  %v3611_v22 = vpop.f32.mrf.mxu1 }
 0x16a   : > { %v5163_v6 = vadd.f32 %v2019_v49, %v1880_v52  ;;  %v1885_v31 = vadd.f32 %v3611_v22, %v5018_v43 }
 0x16b   : > { %v2032_v36 = vpop.f32.mrf.mxu0  ;;  %v1804_v10 = vpop.f32.mrf.mxu1 }
 0x16c   : > { %v5166_v55 = vadd.f32 %v3645_v57, %v1885_v31  ;;  %v1883_v47 = vadd.f32 %v1804_v10, %v5024_v11 }
 0x16d   : > { %v3646_v56 = vpop.f32.mrf.mxu0  ;;  %v3612_v13 = vpop.f32.mrf.mxu1 }
 0x16e   : > { %v5169_v8 = vadd.f32 %v2032_v36, %v1883_v47  ;;  %v1886_v21 = vadd.f32 %v3612_v13, %v5034_v46 }
 0x16f   : > { %v2035_v50 = vpop.f32.mrf.mxu0  ;;  %v1807_v25 = vpop.f32.mrf.mxu1 }
 0x170   : > { %v5172_v12 = vadd.f32 %v3646_v56, %v1886_v21  ;;  %v1884_v42 = vadd.f32 %v1807_v25, %v5040_v1 }
 0x171   : > { %v3649_v20 = vpop.f32.mrf.mxu0  ;;  %v3615_v43 = vpop.f32.mrf.mxu1 }
 0x172   : > { %5622 = vst [vmem:[#allocation14_spill] sm:$0xff] %v5172_v12  ;;  %v5175_v45 = vadd.f32 %v2035_v50, %v1884_v42  ;;  %v1889_v23 = vadd.f32 %v3615_v43, %v5047_v37 }
 0x173   : > { %v2048_v33 = vpop.f32.mrf.mxu0  ;;  %v1820_v11 = vpop.f32.mrf.mxu1 }
 0x174   : > { %5623 = vst [vmem:[#allocation16_spill] sm:$0xff] %v5175_v45  ;;  %v5178_v17 = vadd.f32 %v3649_v20, %v1889_v23  ;;  %v1887_v16 = vadd.f32 %v1820_v11, %v5058_v3 }
 0x175   : > { %v3650_v4 = vpop.f32.mrf.mxu0  ;;  %v3616_v46 = vpop.f32.mrf.mxu1 }
 0x176   : > { %5624 = vst [vmem:[#allocation7_spill] sm:$0xff] %v5178_v17  ;;  %v5181_v63 = vadd.f32 %v2048_v33, %v1887_v16  ;;  %v1890_v28 = vadd.f32 %v3616_v46, %v5062_v29 }
 0x177   : > { %v2051_v62 = vpop.f32.mrf.mxu0  ;;  %v1823_v1 = vpop.f32.mrf.mxu1 }
 0x178   : > { %5625 = vst [vmem:[#allocation17_spill] sm:$0xff] %v5181_v63  ;;  %v5184_v58 = vadd.f32 %v3650_v4, %v1890_v28  ;;  %v1888_v34 = vadd.f32 %v1823_v1, %v5067_v53 }
 0x179   : > { %v3653_v5 = vpop.f32.mrf.mxu0  ;;  %v3619_v37 = vpop.f32.mrf.mxu1 }
 0x17a   : > { %5626 = vst [vmem:[#allocation9_spill] sm:$0xff] %v5184_v58  ;;  %v5187_v44 = vadd.f32 %v2051_v62, %v1888_v34  ;;  %v1893_v49 = vadd.f32 %v3619_v37, %v5085_v40 }
 0x17b   : > { %v2064_v30 = vpop.f32.mrf.mxu0  ;;  %v1836_v3 = vpop.f32.mrf.mxu1 }
 0x17c   : > { %5627 = vst [vmem:[#allocation13_spill] sm:$0xff] %v5187_v44  ;;  %v5190_v52 = vadd.f32 %v3653_v5, %v1893_v49  ;;  %v1891_v57 = vadd.f32 %v1836_v3, %v5093_v60 }
 0x17d   : > { %v3654_v22 = vpop.f32.mrf.mxu0  ;;  %v3620_v29 = vpop.f32.mrf.mxu1 }
 0x17e   : > { %5628 = vst [vmem:[#allocation18_spill] sm:$0xff] %v5190_v52  ;;  %v5193_v31 = vadd.f32 %v2064_v30, %v1891_v57  ;;  %v1894_v36 = vadd.f32 %v3620_v29, %v5095_v26 }
 0x17f   : > { %v2067_v10 = vpop.f32.mrf.mxu0  ;;  %v1839_v53 = vpop.f32.mrf.mxu1 }
 0x180   : > { %5629 = vst [vmem:[#allocation19_spill] sm:$0xff] %v5193_v31  ;;  %v5196_v47 = vadd.f32 %v3654_v22, %v1894_v36  ;;  %v1892_v56 = vadd.f32 %v1839_v53, %v5099_v19 }
 0x181   : > { %v3657_v13 = vpop.f32.mrf.mxu0  ;;  %v3623_v40 = vpop.f32.mrf.mxu1 }
 0x182   : > { %5630 = vst [vmem:[#allocation3_spill] sm:$0xff] %v5196_v47  ;;  %v5199_v21 = vadd.f32 %v2067_v10, %v1892_v56  ;;  %v1897_v50 = vadd.f32 %v3623_v40, %v5107_v48 }
 0x183   : > { %v2080_v25 = vpop.f32.mrf.mxu0  ;;  %v1852_v60 = vpop.f32.mrf.mxu1 }
 0x184   : > { %5631 = vst [vmem:[#allocation10_spill] sm:$0xff] %v5199_v21  ;;  %v5202_v42 = vadd.f32 %v3657_v13, %v1897_v50  ;;  %v1895_v20 = vadd.f32 %v1852_v60, %v5111_v2 }
 0x185   : > { %v3658_v43 = vpop.f32.mrf.mxu0  ;;  %v3624_v26 = vpop.f32.mrf.mxu1 }
 0x186   : > { %5632 = vst [vmem:[#allocation12_spill] sm:$0xff] %v5202_v42  ;;  %v5205_v23 = vadd.f32 %v2080_v25, %v1895_v20  ;;  %v1898_v33 = vadd.f32 %v3624_v26, %v5113_v61 }
 0x187   : > { %v2083_v11 = vpop.f32.mrf.mxu0  ;;  %v1855_v19 = vpop.f32.mrf.mxu1 }
 0x188   : > { %5633 = vst [vmem:[#allocation15_spill] sm:$0xff] %v5205_v23  ;;  %v5208_v16 = vadd.f32 %v3658_v43, %v1898_v33  ;;  %v1896_v4 = vadd.f32 %v1855_v19, %v5115_v14 }
 0x189   : > { %v5211_v46 = vpop.f32.mrf.mxu0  ;;  %v3663_v48 = vpop.f32.mrf.mxu1 }
 0x18a   : > { %5634 = vst [vmem:[#allocation5_spill] sm:$0xff] %v5208_v16  ;;  %v5213_v28 = vadd.f32 %v2083_v11, %v1896_v4 }
 0x18b   : > { %v5215_v62 = vpop.f32.mrf.mxu0  ;;  %v2180_v2 = vpop.f32.mrf.mxu1 }
 0x18c   : > { %5635 = vst [vmem:[#allocation2_spill] sm:$0xff] %v5213_v28 }
 0x18d   : > { %v5217_v1 = vpop.f32.mrf.mxu0  ;;  %v3664_v34 = vpop.f32.mrf.mxu1 }
 0x18f   : > { %v5219_v5 = vpop.f32.mrf.mxu0  ;;  %v5221_v61 = vpop.f32.mrf.mxu1 }
 0x191   : > { %v5223_v37 = vpop.f32.mrf.mxu0  ;;  %v5225_v49 = vpop.f32.mrf.mxu1 }
 0x193   : > { %v5227_v14 = vpop.f32.mrf.mxu0  ;;  %v5229_v30 = vpop.f32.mrf.mxu1 }
 0x195   : > { %v5231_v3 = vpop.f32.mrf.mxu0  ;;  %v5233_v57 = vpop.f32.mrf.mxu1 }
 0x197   : > { %v5235_v22 = vpop.f32.mrf.mxu0  ;;  %v5237_v29 = vpop.f32.mrf.mxu1 }
 0x199   : > { %v5239_v36 = vpop.f32.mrf.mxu0  ;;  %v5241_v10 = vpop.f32.mrf.mxu1 }
 0x19b   : > { %v5243_v53 = vpop.f32.mrf.mxu0  ;;  %v5245_v56 = vpop.f32.mrf.mxu1 }
 0x19d   : > { %v5247_v13 = vpop.f32.mrf.mxu0  ;;  %v5249_v40 = vpop.f32.mrf.mxu1 }
 0x19f   : > { %v5251_v50 = vpop.f32.mrf.mxu0  ;;  %v5253_v25 = vpop.f32.mrf.mxu1 }
 0x1a1   : > { %v5255_v60 = vpop.f32.mrf.mxu0  ;;  %v5257_v20 = vpop.f32.mrf.mxu1 }
 0x1a3   : > { %v5259_v43 = vpop.f32.mrf.mxu0  ;;  %v5261_v26 = vpop.f32.mrf.mxu1 }
 0x1a5   : > { %v5263_v33 = vpop.f32.mrf.mxu0  ;;  %v5265_v11 = vpop.f32.mrf.mxu1 }
 0x1a7   : > { %v5267_v19 = vpop.f32.mrf.mxu0  ;;  %v5269_v4 = vpop.f32.mrf.mxu1 }
 0x1a9   : > { %v5271_v28 = vpop.f32.mrf.mxu0  ;;  %v5273_v16 = vpop.f32.mrf.mxu1 }
 0x1ab   : > { %v5275_v23 = vpop.f32.mrf.mxu0  ;;  %v5277_v42 = vpop.f32.mrf.mxu1 }
 0x1ac   : > { %5636 = vst [vmem:[#allocation4_spill] sm:$0xff] %v5275_v23 }
 0x1ad   : > { %v5279_v21 = vpop.f32.mrf.mxu0  ;;  %v5281_v47 = vpop.f32.mrf.mxu1 }
 0x1ae   : > { %5637 = vst [vmem:[#allocation6_spill] sm:$0xff] %v5279_v21  ;;  %5638 = vst [vmem:[#allocation8_spill] sm:$0xff] %v5281_v47 }
 0x1af   : > { %v5283_v31 = vpop.f32.mrf.mxu0  ;;  %v5285_v52 = vpop.f32.mrf.mxu1 }
 0x1b0   : > { %5639 = vst [vmem:[#allocation11_spill] sm:$0xff] %v5283_v31  ;;  %5640 = vst [vmem:[#allocation20_spill] sm:$0xff] %v5285_v52 }
 0x1b1   : > { %v5287_v44 = vpop.f32.mrf.mxu0  ;;  %v5289_v58 = vpop.f32.mrf.mxu1 }
 0x1b2   : > { %5641 = vst [vmem:[#allocation21_spill] sm:$0xff] %v5287_v44  ;;  %5642 = vst [vmem:[#allocation22_spill] sm:$0xff] %v5289_v58 }
 0x1b3   : > { %v5291_v63 = vpop.f32.mrf.mxu0  ;;  %v5293_v17 = vpop.f32.mrf.mxu1 }
 0x1b4   : > { %5643 = vst [vmem:[#allocation23_spill] sm:$0xff] %v5291_v63  ;;  %5644 = vst [vmem:[#allocation24_spill] sm:$0xff] %v5293_v17 }
 0x1b5   : > { %v5295_v45 = vpop.f32.mrf.mxu0  ;;  %v5297_v23 = vpop.f32.mrf.mxu1 }
 0x1b6   : > { %5645 = vst [vmem:[#allocation25_spill] sm:$0xff] %v5295_v45  ;;  %5646 = vst [vmem:[#allocation26_spill] sm:$0xff] %v5297_v23 }
 0x1b7   : > { %v5299_v12 = vpop.f32.mrf.mxu0  ;;  %v5301_v21 = vpop.f32.mrf.mxu1 }
 0x1b8   : > { %5647 = vst [vmem:[#allocation27_spill] sm:$0xff] %v5299_v12  ;;  %5648 = vst [vmem:[#allocation28_spill] sm:$0xff] %v5301_v21 }
 0x1b9   : > { %v5303_v47 = vpop.f32.mrf.mxu0  ;;  %v5305_v31 = vpop.f32.mrf.mxu1 }
 0x1ba   : > { %5649 = vst [vmem:[#allocation29_spill] sm:$0xff] %v5303_v47  ;;  %5650 = vst [vmem:[#allocation30_spill] sm:$0xff] %v5305_v31 }
 0x1bb   : > { %v5307_v52 = vpop.f32.mrf.mxu0  ;;  %v5309_v44 = vpop.f32.mrf.mxu1 }
 0x1bc   : > { %5651 = vst [vmem:[#allocation31_spill] sm:$0xff] %v5307_v52  ;;  %5652 = vst [vmem:[#allocation32_spill] sm:$0xff] %v5309_v44  ;;  %v2309_v52 = vadd.f32 %v3663_v48, %v5118_v41  ;;  %v2308_v41 = vadd.f32 %v5221_v61, %v5127_v9 }
 0x1bd   : > { %v5311_v58 = vpop.f32.mrf.mxu0  ;;  %v5313_v63 = vpop.f32.mrf.mxu1 }
 0x1be   : > { %5653 = vst [vmem:[#allocation33_spill] sm:$0xff] %v5311_v58  ;;  %5654 = vst [vmem:[#allocation34_spill] sm:$0xff] %v5313_v63  ;;  %v2307_v63 = vadd.f32 %v2180_v2, %v5121_v35  ;;  %v2514_v9 = vadd.f32 %v5219_v5, %v2308_v41 }
 0x1bf   : > { %v5315_v45 = vpop.f32.mrf.mxu0  ;;  %v5317_v23 = vpop.f32.mrf.mxu1 }
 0x1c0   : > { %5655 = vst [vmem:[#allocation35_spill] sm:$0xff] %v5315_v45  ;;  %5656 = vst [vmem:[#allocation36_spill] sm:$0xff] %v5317_v23 }
 0x1c1   : > { %v5319_v12 = vpop.f32.mrf.mxu0  ;;  %v5321_v21 = vpop.f32.mrf.mxu1 }
 0x1c2   : > { %5657 = vst [vmem:[#allocation37_spill] sm:$0xff] %v5319_v12  ;;  %5658 = vst [vmem:[#allocation38_spill] sm:$0xff] %v5321_v21  ;;  %v2515_v12 = vadd.f32 %v5211_v46, %v2309_v52  ;;  %v2310_v21 = vadd.f32 %v3664_v34, %v5124_v54  ;;  %v2313_v52 = vadd.f32 %v5225_v49, %v5130_v15 }
 0x1c3   : > { %v5323_v47 = vpop.f32.mrf.mxu0  ;;  %v5325_v31 = vpop.f32.mrf.mxu1  ;;  %v2314_v15 = vadd.f32 %v5233_v57, %v5136_v7  ;;  %v2317_v7 = vadd.f32 %v5241_v10, %v5142_v27  ;;  %v2318_v27 = vadd.f32 %v5249_v40, %v5148_v32  ;;  %v2321_v32 = vadd.f32 %v5257_v20, %v5154_v24 }
 0x1c4   : > { %5659 = vst [vmem:[#allocation39_spill] sm:$0xff] %v5323_v47  ;;  %5660 = vst [vmem:[#allocation40_spill] sm:$0xff] %v5325_v31  ;;  %v2513_v31 = vadd.f32 %v5215_v62, %v2307_v63  ;;  %v2516_v54 = vadd.f32 %v5217_v1, %v2310_v21  ;;  %v2519_v21 = vadd.f32 %v5223_v37, %v2313_v52 }
 0x1c5   : > { %v5328_v44 = vpop.f32.mrf.mxu0  ;;  %v5330_v58 = vpop.f32.mrf.mxu1  ;;  %v2322_v24 = vadd.f32 %v5265_v11, %v5160_v51  ;;  %v2325_v51 = vadd.f32 %v5273_v16, %v5166_v55  ;;  %v5664_v55 = vld [vmem:[#allocation8_spill] sm:$0xff] }
 0x1c6   : > { %5661 = vst [vmem:[#allocation41_spill] sm:$0xff] %v5328_v44 }
 0x1c7   : > { %v5333_v17 = vpop.f32.mrf.mxu0  ;;  %v5335_v45 = vpop.f32.mrf.mxu1 }
 0x1c8   : > { %5662 = vst [vmem:[#allocation42_spill] sm:$0xff] %v5333_v17 }
 0x1c9   : > { %v3765_v47 = vpop.f32.mrf.mxu0  ;;  %v3731_v23 = vpop.f32.mrf.mxu1 }
 0x1ca   : > { %v2743_v48 = vadd.f32 %v3731_v23, %v2515_v12  ;;  %v2311_v12 = vadd.f32 %v5229_v30, %v5133_v18  ;;  %v2312_v18 = vadd.f32 %v5237_v29, %v5139_v59  ;;  %v2315_v59 = vadd.f32 %v5245_v56, %v5145_v0 }
 0x1cb   : > { %v2826_v44 = vpop.f32.mrf.mxu0  ;;  %v2614_v35 = vpop.f32.mrf.mxu1  ;;  %v2316_v0 = vadd.f32 %v5253_v25, %v5151_v39  ;;  %v2319_v39 = vadd.f32 %v5261_v26, %v5157_v38  ;;  %v2320_v38 = vadd.f32 %v5269_v4, %v5163_v6  ;;  %v2323_v6 = vadd.f32 %v5277_v42, %v5169_v8  ;;  %v5667_v8 = vld [vmem:[#allocation20_spill] sm:$0xff] }
 0x1cc   : > { %v2955_v46 = vadd.f32 %v3765_v47, %v2743_v48  ;;  %v2741_v63 = vadd.f32 %v2614_v35, %v2513_v31  ;;  %v2517_v49 = vadd.f32 %v5227_v14, %v2311_v12  ;;  %v2520_v48 = vadd.f32 %v5231_v3, %v2314_v15 }
 0x1cd   : > { %v3766_v62 = vpop.f32.mrf.mxu0  ;;  %v3732_v2 = vpop.f32.mrf.mxu1  ;;  %v2522_v15 = vadd.f32 %v5251_v50, %v2316_v0 }
 0x1ce   : > { %2987 = vst [vmem:[%s5346_s20 + $0x10] sm:$0xff] %v2955_v46  ;;  %v2953_v23 = vadd.f32 %v2826_v44, %v2741_v63  ;;  %v2744_v34 = vadd.f32 %v3732_v2, %v2516_v54  ;;  %v2518_v54 = vadd.f32 %v5235_v22, %v2312_v18  ;;  %v2523_v63 = vadd.f32 %v5239_v36, %v2317_v7 }
 0x1cf   : > { %v2829_v61 = vpop.f32.mrf.mxu0  ;;  %v2617_v17 = vpop.f32.mrf.mxu1  ;;  %v2525_v18 = vadd.f32 %v5259_v43, %v2319_v39  ;;  %v2526_v7 = vadd.f32 %v5267_v19, %v2320_v38 }
 0x1d0   : > { %2985 = vst [vmem:[%s5346_s20] sm:$0xff] %v2953_v23  ;;  %v2956_v31 = vadd.f32 %v3766_v62, %v2744_v34  ;;  %v2742_v47 = vadd.f32 %v2617_v17, %v2514_v9  ;;  %v2521_v9 = vadd.f32 %v5243_v53, %v2315_v59  ;;  %v2524_v34 = vadd.f32 %v5247_v13, %v2318_v27 }
 0x1d1   : > { %v3769_v1 = vpop.f32.mrf.mxu0  ;;  %v3735_v5 = vpop.f32.mrf.mxu1 }
 0x1d2   : > { %2988 = vst [vmem:[%s5346_s20 + $0x18] sm:$0xff] %v2956_v31  ;;  %v2954_v44 = vadd.f32 %v2829_v61, %v2742_v47  ;;  %v2747_v30 = vadd.f32 %v3735_v5, %v2519_v21 }
 0x1d3   : > { %v2842_v41 = vpop.f32.mrf.mxu0  ;;  %v2630_v37 = vpop.f32.mrf.mxu1 }
 0x1d4   : > { %2986 = vst [vmem:[%s5346_s20 + $0x8] sm:$0xff] %v2954_v44  ;;  %v2959_v17 = vadd.f32 %v3769_v1, %v2747_v30  ;;  %v2745_v57 = vadd.f32 %v2630_v37, %v2517_v49  ;;  %v2527_v1 = vadd.f32 %v5255_v60, %v2321_v32 }
 0x1d5   : > { %v3770_v35 = vpop.f32.mrf.mxu0  ;;  %v3736_v14 = vpop.f32.mrf.mxu1 }
 0x1d6   : > { %2991 = vst [vmem:[%s5346_s20 + $0x30] sm:$0xff] %v2959_v17  ;;  %v2957_v29 = vadd.f32 %v2842_v41, %v2745_v57  ;;  %v2748_v52 = vadd.f32 %v3736_v14, %v2520_v48  ;;  %v2528_v41 = vadd.f32 %v5263_v33, %v2322_v24  ;;  %v5663_v14 = vld [vmem:[#allocation14_spill] sm:$0xff] }
 0x1d7   : > { %v2845_v46 = vpop.f32.mrf.mxu0  ;;  %v2633_v3 = vpop.f32.mrf.mxu1  ;;  %v2326_v16 = vadd.f32 %v5664_v55, %v5663_v14  ;;  %v5684_v55 = vld [vmem:[#allocation19_spill] sm:$0xff] }
 0x1d8   : > { %2989 = vst [vmem:[%s5346_s20 + $0x20] sm:$0xff] %v2957_v29  ;;  %v2960_v10 = vadd.f32 %v3770_v35, %v2748_v52  ;;  %v2746_v62 = vadd.f32 %v2633_v3, %v2518_v54  ;;  %v2531_v35 = vadd.f32 %v5271_v28, %v2325_v51  ;;  %v5665_v52 = vld [vmem:[#allocation4_spill] sm:$0xff] }
 0x1d9   : > { %v3773_v2 = vpop.f32.mrf.mxu0  ;;  %v3739_v22 = vpop.f32.mrf.mxu1  ;;  %v5666_v3 = vld [vmem:[#allocation16_spill] sm:$0xff] }
 0x1da   : > { %2992 = vst [vmem:[%s5346_s20 + $0x38] sm:$0xff] %v2960_v10  ;;  %v2958_v56 = vadd.f32 %v2845_v46, %v2746_v62  ;;  %v2751_v12 = vadd.f32 %v3739_v22, %v2523_v63  ;;  %v2529_v46 = vadd.f32 %v5665_v52, %v2323_v6  ;;  %v2324_v42 = vadd.f32 %v5667_v8, %v5666_v3  ;;  %v5668_v62 = vld [vmem:[#allocation6_spill] sm:$0xff]  ;;  %v5669_v22 = vld [vmem:[#allocation7_spill] sm:$0xff] }
 0x1db   : > { %v2858_v23 = vpop.f32.mrf.mxu0  ;;  %v2646_v36 = vpop.f32.mrf.mxu1  ;;  %v5687_v8 = vld [vmem:[#allocation3_spill] sm:$0xff] }
 0x1dc   : > { %2990 = vst [vmem:[%s5346_s20 + $0x28] sm:$0xff] %v2958_v56  ;;  %v2963_v40 = vadd.f32 %v3773_v2, %v2751_v12  ;;  %v2749_v61 = vadd.f32 %v2646_v36, %v2521_v9  ;;  %v2532_v2 = vadd.f32 %v5668_v62, %v2326_v16  ;;  %v5670_v9 = vld [vmem:[#allocation22_spill] sm:$0xff]  ;;  %v5685_v16 = vld [vmem:[#allocation32_spill] sm:$0xff] }
 0x1dd   : > { %v3774_v21 = vpop.f32.mrf.mxu0  ;;  %v3740_v53 = vpop.f32.mrf.mxu1  ;;  %v2329_v0 = vadd.f32 %v5670_v9, %v5669_v22  ;;  %v5690_v9 = vld [vmem:[#allocation10_spill] sm:$0xff] }
 0x1de   : > { %2995 = vst [vmem:[%s5346_s20 + $0x50] sm:$0xff] %v2963_v40  ;;  %v2961_v25 = vadd.f32 %v2858_v23, %v2749_v61  ;;  %v2752_v31 = vadd.f32 %v3740_v53, %v2524_v34  ;;  %v5671_v34 = vld [vmem:[#allocation11_spill] sm:$0xff]  ;;  %v5672_v40 = vld [vmem:[#allocation17_spill] sm:$0xff]  ;;  %v5673_v61 = vld [vmem:[#allocation24_spill] sm:$0xff] }
 0x1df   : > { %v2861_v47 = vpop.f32.mrf.mxu0  ;;  %v2649_v13 = vpop.f32.mrf.mxu1  ;;  %v2530_v32 = vadd.f32 %v5671_v34, %v2324_v42  ;;  %v5688_v42 = vld [vmem:[#allocation34_spill] sm:$0xff] }
 0x1e0   : > { %2993 = vst [vmem:[%s5346_s20 + $0x40] sm:$0xff] %v2961_v25  ;;  %v2964_v20 = vadd.f32 %v3774_v21, %v2752_v31  ;;  %v2750_v5 = vadd.f32 %v2649_v13, %v2522_v15  ;;  %v2327_v21 = vadd.f32 %v5673_v61, %v5672_v40  ;;  %v5674_v31 = vld [vmem:[#allocation21_spill] sm:$0xff]  ;;  %v5693_v61 = vld [vmem:[#allocation12_spill] sm:$0xff] }
 0x1e1   : > { %v3777_v49 = vpop.f32.mrf.mxu0  ;;  %v3743_v50 = vpop.f32.mrf.mxu1  ;;  %v5675_v13 = vld [vmem:[#allocation9_spill] sm:$0xff] }
 0x1e2   : > { %2996 = vst [vmem:[%s5346_s20 + $0x58] sm:$0xff] %v2964_v20  ;;  %v2962_v26 = vadd.f32 %v2861_v47, %v2750_v5  ;;  %v2755_v44 = vadd.f32 %v3743_v50, %v2527_v1  ;;  %v2535_v47 = vadd.f32 %v5674_v31, %v2329_v0  ;;  %v5676_v1 = vld [vmem:[#allocation26_spill] sm:$0xff]  ;;  %v5691_v0 = vld [vmem:[#allocation36_spill] sm:$0xff] }
 0x1e3   : > { %v2874_v30 = vpop.f32.mrf.mxu0  ;;  %v2662_v60 = vpop.f32.mrf.mxu1  ;;  %v2330_v24 = vadd.f32 %v5676_v1, %v5675_v13  ;;  %v5696_v1 = vld [vmem:[#allocation15_spill] sm:$0xff] }
 0x1e4   : > { %2994 = vst [vmem:[%s5346_s20 + $0x48] sm:$0xff] %v2962_v26  ;;  %v2967_v11 = vadd.f32 %v3777_v49, %v2755_v44  ;;  %v2753_v37 = vadd.f32 %v2662_v60, %v2525_v18  ;;  %v5677_v18 = vld [vmem:[#allocation23_spill] sm:$0xff]  ;;  %v5678_v26 = vld [vmem:[#allocation13_spill] sm:$0xff]  ;;  %v5679_v44 = vld [vmem:[#allocation28_spill] sm:$0xff] }
 0x1e5   : > { %v3778_v48 = vpop.f32.mrf.mxu0  ;;  %v3744_v43 = vpop.f32.mrf.mxu1  ;;  %v2533_v38 = vadd.f32 %v5677_v18, %v2327_v21  ;;  %v5694_v21 = vld [vmem:[#allocation38_spill] sm:$0xff] }
 0x1e6   : > { %2999 = vst [vmem:[%s5346_s20 + $0x70] sm:$0xff] %v2967_v11  ;;  %v2965_v4 = vadd.f32 %v2874_v30, %v2753_v37  ;;  %v2756_v17 = vadd.f32 %v3744_v43, %v2528_v41  ;;  %v2328_v30 = vadd.f32 %v5679_v44, %v5678_v26  ;;  %v5680_v37 = vld [vmem:[#allocation25_spill] sm:$0xff]  ;;  %v5681_v43 = vld [vmem:[#allocation18_spill] sm:$0xff] }
 0x1e7   : > { %v2877_v57 = vpop.f32.mrf.mxu0  ;;  %v2665_v33 = vpop.f32.mrf.mxu1  ;;  %v5699_v44 = vld [vmem:[#allocation5_spill] sm:$0xff] }
 0x1e8   : > { %2997 = vst [vmem:[%s5346_s20 + $0x60] sm:$0xff] %v2965_v4  ;;  %v2968_v54 = vadd.f32 %v3778_v48, %v2756_v17  ;;  %v2754_v59 = vadd.f32 %v2665_v33, %v2526_v7  ;;  %v2536_v48 = vadd.f32 %v5680_v37, %v2330_v24  ;;  %v5682_v7 = vld [vmem:[#allocation30_spill] sm:$0xff]  ;;  %v5697_v24 = vld [vmem:[#allocation40_spill] sm:$0xff]  ;;  %v5700_v37 = vld [vmem:[#allocation39_spill] sm:$0xff] }
 0x1e9   : > { %v3781_v29 = vpop.f32.mrf.mxu0  ;;  %v3747_v19 = vpop.f32.mrf.mxu1  ;;  %v2333_v6 = vadd.f32 %v5682_v7, %v5681_v43  ;;  %v5701_v43 = vld [vmem:[#allocation2_spill] sm:$0xff] }
 0x1ea   : > { %3000 = vst [vmem:[%s5346_s20 + $0x78] sm:$0xff] %v2968_v54  ;;  %v2966_v63 = vadd.f32 %v2877_v57, %v2754_v59  ;;  %v2759_v27 = vadd.f32 %v3747_v19, %v2531_v35  ;;  %v5683_v35 = vld [vmem:[#allocation27_spill] sm:$0xff]  ;;  %v2331_v54 = vadd.f32 %v5685_v16, %v5684_v55  ;;  %v2336_v7 = vadd.f32 %v5335_v45, %v5701_v43 }
 0x1eb   : > { %v2890_v10 = vpop.f32.mrf.mxu0  ;;  %v2678_v28 = vpop.f32.mrf.mxu1  ;;  %v2534_v14 = vadd.f32 %v5683_v35, %v2328_v30  ;;  %v2338_v30 = vadd.f32 %v5330_v58, %v5699_v44 }
 0x1ec   : > { %2998 = vst [vmem:[%s5346_s20 + $0x68] sm:$0xff] %v2966_v63  ;;  %v2971_v56 = vadd.f32 %v3781_v29, %v2759_v27  ;;  %v2757_v12 = vadd.f32 %v2678_v28, %v2529_v46  ;;  %v5686_v46 = vld [vmem:[#allocation29_spill] sm:$0xff]  ;;  %v2334_v63 = vadd.f32 %v5688_v42, %v5687_v8 }
 0x1ed   : > { %v3782_v23 = vpop.f32.mrf.mxu0  ;;  %v3748_v36 = vpop.f32.mrf.mxu1  ;;  %v2539_v3 = vadd.f32 %v5686_v46, %v2333_v6 }
 0x1ee   : > { %3003 = vst [vmem:[%s5346_s20 + $0x90] sm:$0xff] %v2971_v56  ;;  %v2969_v53 = vadd.f32 %v2890_v10, %v2757_v12  ;;  %v2760_v15 = vadd.f32 %v3748_v36, %v2532_v2  ;;  %v5689_v2 = vld [vmem:[#allocation31_spill] sm:$0xff]  ;;  %v2332_v56 = vadd.f32 %v5691_v0, %v5690_v9 }
 0x1ef   : > { %v2893_v39 = vpop.f32.mrf.mxu0  ;;  %v2681_v25 = vpop.f32.mrf.mxu1  ;;  %v2537_v22 = vadd.f32 %v5689_v2, %v2331_v54  ;;  %v5703_v54 = vld [vmem:[#allocation42_spill] sm:$0xff] }
 0x1f0   : > { %3001 = vst [vmem:[%s5346_s20 + $0x80] sm:$0xff] %v2969_v53  ;;  %v2972_v20 = vadd.f32 %v3782_v23, %v2760_v15  ;;  %v2758_v5 = vadd.f32 %v2681_v25, %v2530_v32  ;;  %v5692_v32 = vld [vmem:[#allocation33_spill] sm:$0xff]  ;;  %v2337_v53 = vadd.f32 %v5694_v21, %v5693_v61 }
 0x1f1   : > { %v3785_v49 = vpop.f32.mrf.mxu0  ;;  %v3751_v50 = vpop.f32.mrf.mxu1  ;;  %v2540_v40 = vadd.f32 %v5692_v32, %v2334_v63 }
 0x1f2   : > { %3004 = vst [vmem:[%s5346_s20 + $0x98] sm:$0xff] %v2972_v20  ;;  %v2970_v60 = vadd.f32 %v2893_v39, %v2758_v5  ;;  %v2763_v41 = vadd.f32 %v3751_v50, %v2535_v47  ;;  %v5695_v47 = vld [vmem:[#allocation35_spill] sm:$0xff]  ;;  %v2335_v20 = vadd.f32 %v5697_v24, %v5696_v1 }
 0x1f3   : > { %v2906_v51 = vpop.f32.mrf.mxu0  ;;  %v2694_v11 = vpop.f32.mrf.mxu1  ;;  %v2538_v13 = vadd.f32 %v5695_v47, %v2332_v56 }
 0x1f4   : > { %3002 = vst [vmem:[%s5346_s20 + $0x88] sm:$0xff] %v2970_v60  ;;  %v2975_v4 = vadd.f32 %v3785_v49, %v2763_v41  ;;  %v2761_v17 = vadd.f32 %v2694_v11, %v2533_v38  ;;  %v5698_v38 = vld [vmem:[#allocation37_spill] sm:$0xff] }
 0x1f5   : > { %v3786_v57 = vpop.f32.mrf.mxu0  ;;  %v3752_v33 = vpop.f32.mrf.mxu1  ;;  %v2543_v26 = vadd.f32 %v5698_v38, %v2337_v53 }
 0x1f6   : > { %3007 = vst [vmem:[%s5346_s20 + $0xb0] sm:$0xff] %v2975_v4  ;;  %v2973_v59 = vadd.f32 %v2906_v51, %v2761_v17  ;;  %v2764_v29 = vadd.f32 %v3752_v33, %v2536_v48  ;;  %v2541_v48 = vadd.f32 %v5700_v37, %v2335_v20  ;;  %v5702_v33 = vld [vmem:[#allocation41_spill] sm:$0xff] }
 0x1f7   : > { %v2909_v19 = vpop.f32.mrf.mxu0  ;;  %v2697_v52 = vpop.f32.mrf.mxu1  ;;  %v2544_v58 = vadd.f32 %v5702_v33, %v2338_v30 }
 0x1f8   : > { %3005 = vst [vmem:[%s5346_s20 + $0xa0] sm:$0xff] %v2973_v59  ;;  %v2976_v27 = vadd.f32 %v3786_v57, %v2764_v29  ;;  %v2762_v10 = vadd.f32 %v2697_v52, %v2534_v14  ;;  %v2542_v59 = vadd.f32 %v5703_v54, %v2336_v7 }
 0x1f9   : > { %v3789_v28 = vpop.f32.mrf.mxu0  ;;  %v3755_v62 = vpop.f32.mrf.mxu1 }
 0x1fa   : > { %3008 = vst [vmem:[%s5346_s20 + $0xb8] sm:$0xff] %v2976_v27  ;;  %v2974_v12 = vadd.f32 %v2909_v19, %v2762_v10  ;;  %v2767_v23 = vadd.f32 %v3755_v62, %v2539_v3 }
 0x1fb   : > { %v2922_v36 = vpop.f32.mrf.mxu0  ;;  %v2710_v34 = vpop.f32.mrf.mxu1 }
 0x1fc   : > { %3006 = vst [vmem:[%s5346_s20 + $0xa8] sm:$0xff] %v2974_v12  ;;  %v2979_v15 = vadd.f32 %v3789_v28, %v2767_v23  ;;  %v2765_v39 = vadd.f32 %v2710_v34, %v2537_v22 }
 0x1fd   : > { %v3790_v25 = vpop.f32.mrf.mxu0  ;;  %v3756_v31 = vpop.f32.mrf.mxu1 }
 0x1fe   : > { %3011 = vst [vmem:[%s5346_s20 + $0xd0] sm:$0xff] %v2979_v15  ;;  %v2977_v5 = vadd.f32 %v2922_v36, %v2765_v39  ;;  %v2768_v49 = vadd.f32 %v3756_v31, %v2540_v40 }
 0x1ff   : > { %v2925_v50 = vpop.f32.mrf.mxu0  ;;  %v2713_v18 = vpop.f32.mrf.mxu1 }
 0x200   : > { %3009 = vst [vmem:[%s5346_s20 + $0xc0] sm:$0xff] %v2977_v5  ;;  %v2980_v60 = vadd.f32 %v3790_v25, %v2768_v49  ;;  %v2766_v41 = vadd.f32 %v2713_v18, %v2538_v13 }
 0x201   : > { %v3793_v51 = vpop.f32.mrf.mxu0  ;;  %v3759_v11 = vpop.f32.mrf.mxu1 }
 0x202   : > { %3012 = vst [vmem:[%s5346_s20 + $0xd8] sm:$0xff] %v2980_v60  ;;  %v2978_v6 = vadd.f32 %v2925_v50, %v2766_v41  ;;  %v2771_v4 = vadd.f32 %v3759_v11, %v2543_v26 }
 0x203   : > { %v2938_v17 = vpop.f32.mrf.mxu0  ;;  %v2726_v57 = vpop.f32.mrf.mxu1 }
 0x204   : > { %3010 = vst [vmem:[%s5346_s20 + $0xc8] sm:$0xff] %v2978_v6  ;;  %v2983_v35 = vadd.f32 %v3793_v51, %v2771_v4  ;;  %v2769_v14 = vadd.f32 %v2726_v57, %v2541_v48 }
 0x205   : > { %v3760_v55 = vpop.f32.mrf.mxu1  ;;  %v3794_v16 = vpop.f32.mrf.mxu0 }
 0x206   : > { %3015 = vst [vmem:[%s5346_s20 + $0xf0] sm:$0xff] %v2983_v35  ;;  %v2981_v29 = vadd.f32 %v2938_v17, %v2769_v14  ;;  %v2772_v45 = vadd.f32 %v3760_v55, %v2544_v58 }
 0x207   : > { %v2729_v19 = vpop.f32.mrf.mxu1  ;;  %v2941_v3 = vpop.f32.mrf.mxu0 }
 0x208   : > { %3013 = vst [vmem:[%s5346_s20 + $0xe0] sm:$0xff] %v2981_v29  ;;  %v2984_v52 = vadd.f32 %v3794_v16, %v2772_v45  ;;  %v2770_v46 = vadd.f32 %v2729_v19, %v2542_v59 }
 0x20a   : > { %3016 = vst [vmem:[%s5346_s20 + $0xf8] sm:$0xff] %v2984_v52  ;;  %v2982_v8 = vadd.f32 %v2941_v3, %v2770_v46 }
 0x20c   : > { %3014 = vst [vmem:[%s5346_s20 + $0xe8] sm:$0xff] %v2982_v8 }
 0x20d PF: > { %s13_s14 = sadd.s32 1, %s3872_s14   ;;  %s5704_s12 = smov %s3868_s13 }
 0x20e   : > { %p10_p5 = scmp.ge.s32.totalorder %s13_s14, 4   ;;  %s5705_s13 = smov %s5707_s15 }
 0x210   :  { %12 = sbr.rel (!%p10_p5) target bundleno = 2 (0x2), region = 71 }

</bundles_post_ra>
